<compile_context>
chip_gen: v6e
topology: v6e:2x2x1
jax: 0.10.0
libtpu: 0.0.40
codegen_flags: <defaults>
</compile_context>

<pallas_src>
import functools

import jax
import jax.numpy as jnp
from jax.experimental import pallas as pl
from jax.experimental.pallas import tpu as pltpu


def cartpole_kernel(x_ref, w1_ref, b1_ref, w2_ref, b2_ref, o_ref):
    # x_ref : (S, TB)  VMEM  — batch on the lane axis.
    # w1_ref: (S, H)   SMEM   w1[s, j]  (transpose of torch fc1.weight)
    # b1_ref: (H,)     SMEM
    # w2_ref: (H, A)   SMEM   w2[j, a]  (transpose of torch fc2.weight)
    # b2_ref: (A,)     SMEM
    # o_ref : (A, TB)  VMEM  — lane-dense output block.
    S = x_ref.shape[0]
    H = w1_ref.shape[1]
    A = o_ref.shape[0]

    # Load the S batch lane-vectors once; everything below is scalar*vector VPU work.
    x = [x_ref[s : s + 1, :] for s in range(S)]

    # fc1 (+ReLU) and fc2 fused: each hidden unit h_j is produced, rectified, and
    # immediately folded into the A logit accumulators, so only x, the A logits and
    # one transient h_j are live at any time.
    logits = [None] * A
    for j in range(H):
        h_j = x[0] * w1_ref[0, j]
        for s in range(1, S):
            h_j = h_j + x[s] * w1_ref[s, j]
        h_j = jnp.maximum(h_j + b1_ref[j], 0.0)            # (1, TB)
        for a in range(A):
            contrib = h_j * w2_ref[j, a]
            logits[a] = contrib if logits[a] is None else logits[a] + contrib
    logits = [logits[a] + b2_ref[a] for a in range(A)]

    if A == 2:
        # softmax over 2 classes == sigmoid of the logit difference: one exp per lane.
        d = logits[1] - logits[0]                            # (1, TB)
        p1 = 1.0 / (1.0 + jnp.exp(-d))
        o_ref[0:1, :] = 1.0 - p1
        o_ref[1:2, :] = p1
    else:
        # Generic softmax over the (small, unrolled) class axis — fully lane-local,
        # exact division so probabilities sum to 1 tightly.
        m = logits[0]
        for a in range(1, A):
            m = jnp.maximum(m, logits[a])
        e = [jnp.exp(l - m) for l in logits]
        den = e[0]
        for a in range(1, A):
            den = den + e[a]
        inv = 1.0 / den
        for a in range(A):
            o_ref[a : a + 1, :] = e[a] * inv


@functools.partial(jax.jit, static_argnames=("block_b",))
def cartpole_forward_t(xT, w1, b1, w2, b2, *, block_b=512):
    """Lane-dense forward.  xT: (s_size, B) f32.  Returns action probs as (a_size, B)."""
    S, B = xT.shape
    A = w2.shape[1]

    if B <= block_b:
        TB = B                                   # single block: lane dim == full array dim
    else:
        TB = max(128, (block_b // 128) * 128)    # lane blocks must be multiples of 128

    grid = (pl.cdiv(B, TB),)                     # ragged last block handled by Pallas
    smem = pl.BlockSpec(memory_space=pltpu.MemorySpace.SMEM)

    return pl.pallas_call(
        cartpole_kernel,
        out_shape=jax.ShapeDtypeStruct((A, B), jnp.float32),
        grid=grid,
        in_specs=[
            # x streams lane-blocks of the batch over the grid.
            pl.BlockSpec((S, TB), lambda i: (0, i)),
            # Tiny weight/bias tables: resident SMEM scalars, no per-step re-DMA,
            # no double-buffering.
            smem, smem, smem, smem,
        ],
        out_specs=pl.BlockSpec((A, TB), lambda i: (0, i)),
        # Batch blocks are embarrassingly parallel: lets v7x shard grid steps across
        # both TensorCores; harmless on single-TC v5e/v6e.
        compiler_params=pltpu.CompilerParams(dimension_semantics=("parallel",)),
    )(xT, w1, b1, w2, b2)


@functools.partial(jax.jit, static_argnames=("block_b",))
def cartpole_forward(x, w1, b1, w2, b2, *, block_b=512):
    """Module-equivalent interface: x is (B, s_size); returns (B, a_size) probabilities.

    The transposes here are layout plumbing only; callers that already keep rollout
    states as (s_size, B) and consume (a_size, B) probs should call cartpole_forward_t.
    """
    return cartpole_forward_t(x.T, w1, b1, w2, b2, block_b=block_b).T


def init_params(key, s_size=4, h_size=16, a_size=2):
    # torch.nn.Linear-style init: U(-1/sqrt(fan_in), +1/sqrt(fan_in)).
    # Weights stored as (in, out) == transpose of torch's (out, in); biases 1-D.
    k1, k2, k3, k4 = jax.random.split(key, 4)
    bound1 = 1.0 / jnp.sqrt(jnp.float32(s_size))
    bound2 = 1.0 / jnp.sqrt(jnp.float32(h_size))
    w1 = jax.random.uniform(k1, (s_size, h_size), jnp.float32, -bound1, bound1)
    b1 = jax.random.uniform(k2, (h_size,), jnp.float32, -bound1, bound1)
    w2 = jax.random.uniform(k3, (h_size, a_size), jnp.float32, -bound2, bound2)
    b2 = jax.random.uniform(k4, (a_size,), jnp.float32, -bound2, bound2)
    return w1, b1, w2, b2


def _reference(x, w1, b1, w2, b2):
    h = jnp.maximum(x @ w1 + b1[None, :], 0.0)
    return jax.nn.softmax(h @ w2 + b2[None, :], axis=1)


if __name__ == "__main__":
    key = jax.random.PRNGKey(0)
    kx1, kx2, kp = jax.random.split(key, 3)

    S, H, A = 4, 16, 2  # s_size, h_size, a_size (module defaults)
    w1, b1, w2, b2 = init_params(kp, S, H, A)

    # Case 1: tiny batch like the module's on_state() usage (single-block path).
    x_small = jax.random.normal(kx1, (2, S), jnp.float32)
    out_small = jax.block_until_ready(cartpole_forward(x_small, w1, b1, w2, b2))
    ref_small = _reference(x_small, w1, b1, w2, b2)
    assert out_small.shape == (2, A)
    assert jnp.allclose(out_small, ref_small, atol=1e-5, rtol=1e-5)
    assert jnp.allclose(jnp.sum(out_small, axis=1), 1.0, atol=1e-5)

    # Case 2: rollout-sized batch exercising the multi-step parallel grid and the
    # unpadded ragged last block (1000 = 512 + 488, no wrapper pad/slice).
    B_big = 1000
    x_big = jax.random.normal(kx2, (B_big, S), jnp.float32)
    out_big = jax.block_until_ready(
        cartpole_forward(x_big, w1, b1, w2, b2, block_b=512)
    )
    ref_big = _reference(x_big, w1, b1, w2, b2)
    assert out_big.shape == (B_big, A)
    assert jnp.allclose(out_big, ref_big, atol=1e-5, rtol=1e-5)
    assert jnp.allclose(jnp.sum(out_big, axis=1), 1.0, atol=1e-5)

    # TODO(synk): on_state()'s Categorical sampling / log_prob is policy logic outside
    # the nn.Module forward and is intentionally not implemented as part of the kernel.
    print("KERNEL_OK")
</pallas_src>

<mosaic_0001>
module attributes {stable_mosaic.version = 11 : i64} {
  func.func @cartpole_kernel(%arg0: i32, %arg1: memref<4x2xf32, #tpu.memory_space<vmem>>, %arg2: memref<4x16xf32, #tpu.memory_space<smem>>, %arg3: memref<16xf32, #tpu.memory_space<smem>>, %arg4: memref<16x2xf32, #tpu.memory_space<smem>>, %arg5: memref<2xf32, #tpu.memory_space<smem>>, %arg6: memref<2x2xf32, #tpu.memory_space<vmem>>) attributes {dimension_semantics = [#tpu.dimension_semantics<parallel>], iteration_bounds = array<i64: 1>, scalar_prefetch = 0 : i64, scratch_operands = 0 : i64, tpu.core_type = #tpu.core_type<tc>, window_params = [{transform_indices = @transform_0, window_bounds = array<i64: 4, 2>}, {transform_indices = @transform_1, window_bounds = array<i64: 4, 16>}, {transform_indices = @transform_2, window_bounds = array<i64: 16>}, {transform_indices = @transform_3, window_bounds = array<i64: 16, 2>}, {transform_indices = @transform_4, window_bounds = array<i64: 2>}, {transform_indices = @transform_5, window_bounds = array<i64: 2, 2>}]} {
    %c0 = arith.constant 0 : index
    %c0_0 = arith.constant 0 : index
    %0 = vector.load %arg1[%c0, %c0_0] : memref<4x2xf32, #tpu.memory_space<vmem>>, vector<1x2xf32>
    %c1 = arith.constant 1 : index
    %c0_1 = arith.constant 0 : index
    %1 = vector.load %arg1[%c1, %c0_1] : memref<4x2xf32, #tpu.memory_space<vmem>>, vector<1x2xf32>
    %c2 = arith.constant 2 : index
    %c0_2 = arith.constant 0 : index
    %2 = vector.load %arg1[%c2, %c0_2] : memref<4x2xf32, #tpu.memory_space<vmem>>, vector<1x2xf32>
    %c3 = arith.constant 3 : index
    %c0_3 = arith.constant 0 : index
    %3 = vector.load %arg1[%c3, %c0_3] : memref<4x2xf32, #tpu.memory_space<vmem>>, vector<1x2xf32>
    %c0_4 = arith.constant 0 : index
    %c0_5 = arith.constant 0 : index
    %4 = memref.load %arg2[%c0_4, %c0_5] : memref<4x16xf32, #tpu.memory_space<smem>>
    %5 = vector.broadcast %4 : f32 to vector<1x2xf32>
    %6 = arith.mulf %0, %5 : vector<1x2xf32>
    %c1_6 = arith.constant 1 : index
    %c0_7 = arith.constant 0 : index
    %7 = memref.load %arg2[%c1_6, %c0_7] : memref<4x16xf32, #tpu.memory_space<smem>>
    %8 = vector.broadcast %7 : f32 to vector<1x2xf32>
    %9 = arith.mulf %1, %8 : vector<1x2xf32>
    %10 = arith.addf %6, %9 : vector<1x2xf32>
    %c2_8 = arith.constant 2 : index
    %c0_9 = arith.constant 0 : index
    %11 = memref.load %arg2[%c2_8, %c0_9] : memref<4x16xf32, #tpu.memory_space<smem>>
    %12 = vector.broadcast %11 : f32 to vector<1x2xf32>
    %13 = arith.mulf %2, %12 : vector<1x2xf32>
    %14 = arith.addf %10, %13 : vector<1x2xf32>
    %c3_10 = arith.constant 3 : index
    %c0_11 = arith.constant 0 : index
    %15 = memref.load %arg2[%c3_10, %c0_11] : memref<4x16xf32, #tpu.memory_space<smem>>
    %16 = vector.broadcast %15 : f32 to vector<1x2xf32>
    %17 = arith.mulf %3, %16 : vector<1x2xf32>
    %18 = arith.addf %14, %17 : vector<1x2xf32>
    %c0_12 = arith.constant 0 : index
    %19 = memref.load %arg3[%c0_12] : memref<16xf32, #tpu.memory_space<smem>>
    %20 = vector.broadcast %19 : f32 to vector<1x2xf32>
    %21 = arith.addf %18, %20 : vector<1x2xf32>
    %cst = arith.constant 0.000000e+00 : f32
    %22 = vector.broadcast %cst : f32 to vector<1x2xf32>
    %23 = arith.maximumf %21, %22 : vector<1x2xf32>
    %c0_13 = arith.constant 0 : index
    %c0_14 = arith.constant 0 : index
    %24 = memref.load %arg4[%c0_13, %c0_14] : memref<16x2xf32, #tpu.memory_space<smem>>
    %25 = vector.broadcast %24 : f32 to vector<1x2xf32>
    %26 = arith.mulf %23, %25 : vector<1x2xf32>
    %c0_15 = arith.constant 0 : index
    %c1_16 = arith.constant 1 : index
    %27 = memref.load %arg4[%c0_15, %c1_16] : memref<16x2xf32, #tpu.memory_space<smem>>
    %28 = vector.broadcast %27 : f32 to vector<1x2xf32>
    %29 = arith.mulf %23, %28 : vector<1x2xf32>
    %c0_17 = arith.constant 0 : index
    %c1_18 = arith.constant 1 : index
    %30 = memref.load %arg2[%c0_17, %c1_18] : memref<4x16xf32, #tpu.memory_space<smem>>
    %31 = vector.broadcast %30 : f32 to vector<1x2xf32>
    %32 = arith.mulf %0, %31 : vector<1x2xf32>
    %c1_19 = arith.constant 1 : index
    %c1_20 = arith.constant 1 : index
    %33 = memref.load %arg2[%c1_19, %c1_20] : memref<4x16xf32, #tpu.memory_space<smem>>
    %34 = vector.broadcast %33 : f32 to vector<1x2xf32>
    %35 = arith.mulf %1, %34 : vector<1x2xf32>
    %36 = arith.addf %32, %35 : vector<1x2xf32>
    %c2_21 = arith.constant 2 : index
    %c1_22 = arith.constant 1 : index
    %37 = memref.load %arg2[%c2_21, %c1_22] : memref<4x16xf32, #tpu.memory_space<smem>>
    %38 = vector.broadcast %37 : f32 to vector<1x2xf32>
    %39 = arith.mulf %2, %38 : vector<1x2xf32>
    %40 = arith.addf %36, %39 : vector<1x2xf32>
    %c3_23 = arith.constant 3 : index
    %c1_24 = arith.constant 1 : index
    %41 = memref.load %arg2[%c3_23, %c1_24] : memref<4x16xf32, #tpu.memory_space<smem>>
    %42 = vector.broadcast %41 : f32 to vector<1x2xf32>
    %43 = arith.mulf %3, %42 : vector<1x2xf32>
    %44 = arith.addf %40, %43 : vector<1x2xf32>
    %c1_25 = arith.constant 1 : index
    %45 = memref.load %arg3[%c1_25] : memref<16xf32, #tpu.memory_space<smem>>
    %46 = vector.broadcast %45 : f32 to vector<1x2xf32>
    %47 = arith.addf %44, %46 : vector<1x2xf32>
    %cst_26 = arith.constant 0.000000e+00 : f32
    %48 = vector.broadcast %cst_26 : f32 to vector<1x2xf32>
    %49 = arith.maximumf %47, %48 : vector<1x2xf32>
    %c1_27 = arith.constant 1 : index
    %c0_28 = arith.constant 0 : index
    %50 = memref.load %arg4[%c1_27, %c0_28] : memref<16x2xf32, #tpu.memory_space<smem>>
    %51 = vector.broadcast %50 : f32 to vector<1x2xf32>
    %52 = arith.mulf %49, %51 : vector<1x2xf32>
    %53 = arith.addf %26, %52 : vector<1x2xf32>
    %c1_29 = arith.constant 1 : index
    %c1_30 = arith.constant 1 : index
    %54 = memref.load %arg4[%c1_29, %c1_30] : memref<16x2xf32, #tpu.memory_space<smem>>
    %55 = vector.broadcast %54 : f32 to vector<1x2xf32>
    %56 = arith.mulf %49, %55 : vector<1x2xf32>
    %57 = arith.addf %29, %56 : vector<1x2xf32>
    %c0_31 = arith.constant 0 : index
    %c2_32 = arith.constant 2 : index
    %58 = memref.load %arg2[%c0_31, %c2_32] : memref<4x16xf32, #tpu.memory_space<smem>>
    %59 = vector.broadcast %58 : f32 to vector<1x2xf32>
    %60 = arith.mulf %0, %59 : vector<1x2xf32>
    %c1_33 = arith.constant 1 : index
    %c2_34 = arith.constant 2 : index
    %61 = memref.load %arg2[%c1_33, %c2_34] : memref<4x16xf32, #tpu.memory_space<smem>>
    %62 = vector.broadcast %61 : f32 to vector<1x2xf32>
    %63 = arith.mulf %1, %62 : vector<1x2xf32>
    %64 = arith.addf %60, %63 : vector<1x2xf32>
    %c2_35 = arith.constant 2 : index
    %c2_36 = arith.constant 2 : index
    %65 = memref.load %arg2[%c2_35, %c2_36] : memref<4x16xf32, #tpu.memory_space<smem>>
    %66 = vector.broadcast %65 : f32 to vector<1x2xf32>
    %67 = arith.mulf %2, %66 : vector<1x2xf32>
    %68 = arith.addf %64, %67 : vector<1x2xf32>
    %c3_37 = arith.constant 3 : index
    %c2_38 = arith.constant 2 : index
    %69 = memref.load %arg2[%c3_37, %c2_38] : memref<4x16xf32, #tpu.memory_space<smem>>
    %70 = vector.broadcast %69 : f32 to vector<1x2xf32>
    %71 = arith.mulf %3, %70 : vector<1x2xf32>
    %72 = arith.addf %68, %71 : vector<1x2xf32>
    %c2_39 = arith.constant 2 : index
    %73 = memref.load %arg3[%c2_39] : memref<16xf32, #tpu.memory_space<smem>>
    %74 = vector.broadcast %73 : f32 to vector<1x2xf32>
    %75 = arith.addf %72, %74 : vector<1x2xf32>
    %cst_40 = arith.constant 0.000000e+00 : f32
    %76 = vector.broadcast %cst_40 : f32 to vector<1x2xf32>
    %77 = arith.maximumf %75, %76 : vector<1x2xf32>
    %c2_41 = arith.constant 2 : index
    %c0_42 = arith.constant 0 : index
    %78 = memref.load %arg4[%c2_41, %c0_42] : memref<16x2xf32, #tpu.memory_space<smem>>
    %79 = vector.broadcast %78 : f32 to vector<1x2xf32>
    %80 = arith.mulf %77, %79 : vector<1x2xf32>
    %81 = arith.addf %53, %80 : vector<1x2xf32>
    %c2_43 = arith.constant 2 : index
    %c1_44 = arith.constant 1 : index
    %82 = memref.load %arg4[%c2_43, %c1_44] : memref<16x2xf32, #tpu.memory_space<smem>>
    %83 = vector.broadcast %82 : f32 to vector<1x2xf32>
    %84 = arith.mulf %77, %83 : vector<1x2xf32>
    %85 = arith.addf %57, %84 : vector<1x2xf32>
    %c0_45 = arith.constant 0 : index
    %c3_46 = arith.constant 3 : index
    %86 = memref.load %arg2[%c0_45, %c3_46] : memref<4x16xf32, #tpu.memory_space<smem>>
    %87 = vector.broadcast %86 : f32 to vector<1x2xf32>
    %88 = arith.mulf %0, %87 : vector<1x2xf32>
    %c1_47 = arith.constant 1 : index
    %c3_48 = arith.constant 3 : index
    %89 = memref.load %arg2[%c1_47, %c3_48] : memref<4x16xf32, #tpu.memory_space<smem>>
    %90 = vector.broadcast %89 : f32 to vector<1x2xf32>
    %91 = arith.mulf %1, %90 : vector<1x2xf32>
    %92 = arith.addf %88, %91 : vector<1x2xf32>
    %c2_49 = arith.constant 2 : index
    %c3_50 = arith.constant 3 : index
    %93 = memref.load %arg2[%c2_49, %c3_50] : memref<4x16xf32, #tpu.memory_space<smem>>
    %94 = vector.broadcast %93 : f32 to vector<1x2xf32>
    %95 = arith.mulf %2, %94 : vector<1x2xf32>
    %96 = arith.addf %92, %95 : vector<1x2xf32>
    %c3_51 = arith.constant 3 : index
    %c3_52 = arith.constant 3 : index
    %97 = memref.load %arg2[%c3_51, %c3_52] : memref<4x16xf32, #tpu.memory_space<smem>>
    %98 = vector.broadcast %97 : f32 to vector<1x2xf32>
    %99 = arith.mulf %3, %98 : vector<1x2xf32>
    %100 = arith.addf %96, %99 : vector<1x2xf32>
    %c3_53 = arith.constant 3 : index
    %101 = memref.load %arg3[%c3_53] : memref<16xf32, #tpu.memory_space<smem>>
    %102 = vector.broadcast %101 : f32 to vector<1x2xf32>
    %103 = arith.addf %100, %102 : vector<1x2xf32>
    %cst_54 = arith.constant 0.000000e+00 : f32
    %104 = vector.broadcast %cst_54 : f32 to vector<1x2xf32>
    %105 = arith.maximumf %103, %104 : vector<1x2xf32>
    %c3_55 = arith.constant 3 : index
    %c0_56 = arith.constant 0 : index
    %106 = memref.load %arg4[%c3_55, %c0_56] : memref<16x2xf32, #tpu.memory_space<smem>>
    %107 = vector.broadcast %106 : f32 to vector<1x2xf32>
    %108 = arith.mulf %105, %107 : vector<1x2xf32>
    %109 = arith.addf %81, %108 : vector<1x2xf32>
    %c3_57 = arith.constant 3 : index
    %c1_58 = arith.constant 1 : index
    %110 = memref.load %arg4[%c3_57, %c1_58] : memref<16x2xf32, #tpu.memory_space<smem>>
    %111 = vector.broadcast %110 : f32 to vector<1x2xf32>
    %112 = arith.mulf %105, %111 : vector<1x2xf32>
    %113 = arith.addf %85, %112 : vector<1x2xf32>
    %c0_59 = arith.constant 0 : index
    %c4 = arith.constant 4 : index
    %114 = memref.load %arg2[%c0_59, %c4] : memref<4x16xf32, #tpu.memory_space<smem>>
    %115 = vector.broadcast %114 : f32 to vector<1x2xf32>
    %116 = arith.mulf %0, %115 : vector<1x2xf32>
    %c1_60 = arith.constant 1 : index
    %c4_61 = arith.constant 4 : index
    %117 = memref.load %arg2[%c1_60, %c4_61] : memref<4x16xf32, #tpu.memory_space<smem>>
    %118 = vector.broadcast %117 : f32 to vector<1x2xf32>
    %119 = arith.mulf %1, %118 : vector<1x2xf32>
    %120 = arith.addf %116, %119 : vector<1x2xf32>
    %c2_62 = arith.constant 2 : index
    %c4_63 = arith.constant 4 : index
    %121 = memref.load %arg2[%c2_62, %c4_63] : memref<4x16xf32, #tpu.memory_space<smem>>
    %122 = vector.broadcast %121 : f32 to vector<1x2xf32>
    %123 = arith.mulf %2, %122 : vector<1x2xf32>
    %124 = arith.addf %120, %123 : vector<1x2xf32>
    %c3_64 = arith.constant 3 : index
    %c4_65 = arith.constant 4 : index
    %125 = memref.load %arg2[%c3_64, %c4_65] : memref<4x16xf32, #tpu.memory_space<smem>>
    %126 = vector.broadcast %125 : f32 to vector<1x2xf32>
    %127 = arith.mulf %3, %126 : vector<1x2xf32>
    %128 = arith.addf %124, %127 : vector<1x2xf32>
    %c4_66 = arith.constant 4 : index
    %129 = memref.load %arg3[%c4_66] : memref<16xf32, #tpu.memory_space<smem>>
    %130 = vector.broadcast %129 : f32 to vector<1x2xf32>
    %131 = arith.addf %128, %130 : vector<1x2xf32>
    %cst_67 = arith.constant 0.000000e+00 : f32
    %132 = vector.broadcast %cst_67 : f32 to vector<1x2xf32>
    %133 = arith.maximumf %131, %132 : vector<1x2xf32>
    %c4_68 = arith.constant 4 : index
    %c0_69 = arith.constant 0 : index
    %134 = memref.load %arg4[%c4_68, %c0_69] : memref<16x2xf32, #tpu.memory_space<smem>>
    %135 = vector.broadcast %134 : f32 to vector<1x2xf32>
    %136 = arith.mulf %133, %135 : vector<1x2xf32>
    %137 = arith.addf %109, %136 : vector<1x2xf32>
    %c4_70 = arith.constant 4 : index
    %c1_71 = arith.constant 1 : index
    %138 = memref.load %arg4[%c4_70, %c1_71] : memref<16x2xf32, #tpu.memory_space<smem>>
    %139 = vector.broadcast %138 : f32 to vector<1x2xf32>
    %140 = arith.mulf %133, %139 : vector<1x2xf32>
    %141 = arith.addf %113, %140 : vector<1x2xf32>
    %c0_72 = arith.constant 0 : index
    %c5 = arith.constant 5 : index
    %142 = memref.load %arg2[%c0_72, %c5] : memref<4x16xf32, #tpu.memory_space<smem>>
    %143 = vector.broadcast %142 : f32 to vector<1x2xf32>
    %144 = arith.mulf %0, %143 : vector<1x2xf32>
    %c1_73 = arith.constant 1 : index
    %c5_74 = arith.constant 5 : index
    %145 = memref.load %arg2[%c1_73, %c5_74] : memref<4x16xf32, #tpu.memory_space<smem>>
    %146 = vector.broadcast %145 : f32 to vector<1x2xf32>
    %147 = arith.mulf %1, %146 : vector<1x2xf32>
    %148 = arith.addf %144, %147 : vector<1x2xf32>
    %c2_75 = arith.constant 2 : index
    %c5_76 = arith.constant 5 : index
    %149 = memref.load %arg2[%c2_75, %c5_76] : memref<4x16xf32, #tpu.memory_space<smem>>
    %150 = vector.broadcast %149 : f32 to vector<1x2xf32>
    %151 = arith.mulf %2, %150 : vector<1x2xf32>
    %152 = arith.addf %148, %151 : vector<1x2xf32>
    %c3_77 = arith.constant 3 : index
    %c5_78 = arith.constant 5 : index
    %153 = memref.load %arg2[%c3_77, %c5_78] : memref<4x16xf32, #tpu.memory_space<smem>>
    %154 = vector.broadcast %153 : f32 to vector<1x2xf32>
    %155 = arith.mulf %3, %154 : vector<1x2xf32>
    %156 = arith.addf %152, %155 : vector<1x2xf32>
    %c5_79 = arith.constant 5 : index
    %157 = memref.load %arg3[%c5_79] : memref<16xf32, #tpu.memory_space<smem>>
    %158 = vector.broadcast %157 : f32 to vector<1x2xf32>
    %159 = arith.addf %156, %158 : vector<1x2xf32>
    %cst_80 = arith.constant 0.000000e+00 : f32
    %160 = vector.broadcast %cst_80 : f32 to vector<1x2xf32>
    %161 = arith.maximumf %159, %160 : vector<1x2xf32>
    %c5_81 = arith.constant 5 : index
    %c0_82 = arith.constant 0 : index
    %162 = memref.load %arg4[%c5_81, %c0_82] : memref<16x2xf32, #tpu.memory_space<smem>>
    %163 = vector.broadcast %162 : f32 to vector<1x2xf32>
    %164 = arith.mulf %161, %163 : vector<1x2xf32>
    %165 = arith.addf %137, %164 : vector<1x2xf32>
    %c5_83 = arith.constant 5 : index
    %c1_84 = arith.constant 1 : index
    %166 = memref.load %arg4[%c5_83, %c1_84] : memref<16x2xf32, #tpu.memory_space<smem>>
    %167 = vector.broadcast %166 : f32 to vector<1x2xf32>
    %168 = arith.mulf %161, %167 : vector<1x2xf32>
    %169 = arith.addf %141, %168 : vector<1x2xf32>
    %c0_85 = arith.constant 0 : index
    %c6 = arith.constant 6 : index
    %170 = memref.load %arg2[%c0_85, %c6] : memref<4x16xf32, #tpu.memory_space<smem>>
    %171 = vector.broadcast %170 : f32 to vector<1x2xf32>
    %172 = arith.mulf %0, %171 : vector<1x2xf32>
    %c1_86 = arith.constant 1 : index
    %c6_87 = arith.constant 6 : index
    %173 = memref.load %arg2[%c1_86, %c6_87] : memref<4x16xf32, #tpu.memory_space<smem>>
    %174 = vector.broadcast %173 : f32 to vector<1x2xf32>
    %175 = arith.mulf %1, %174 : vector<1x2xf32>
    %176 = arith.addf %172, %175 : vector<1x2xf32>
    %c2_88 = arith.constant 2 : index
    %c6_89 = arith.constant 6 : index
    %177 = memref.load %arg2[%c2_88, %c6_89] : memref<4x16xf32, #tpu.memory_space<smem>>
    %178 = vector.broadcast %177 : f32 to vector<1x2xf32>
    %179 = arith.mulf %2, %178 : vector<1x2xf32>
    %180 = arith.addf %176, %179 : vector<1x2xf32>
    %c3_90 = arith.constant 3 : index
    %c6_91 = arith.constant 6 : index
    %181 = memref.load %arg2[%c3_90, %c6_91] : memref<4x16xf32, #tpu.memory_space<smem>>
    %182 = vector.broadcast %181 : f32 to vector<1x2xf32>
    %183 = arith.mulf %3, %182 : vector<1x2xf32>
    %184 = arith.addf %180, %183 : vector<1x2xf32>
    %c6_92 = arith.constant 6 : index
    %185 = memref.load %arg3[%c6_92] : memref<16xf32, #tpu.memory_space<smem>>
    %186 = vector.broadcast %185 : f32 to vector<1x2xf32>
    %187 = arith.addf %184, %186 : vector<1x2xf32>
    %cst_93 = arith.constant 0.000000e+00 : f32
    %188 = vector.broadcast %cst_93 : f32 to vector<1x2xf32>
    %189 = arith.maximumf %187, %188 : vector<1x2xf32>
    %c6_94 = arith.constant 6 : index
    %c0_95 = arith.constant 0 : index
    %190 = memref.load %arg4[%c6_94, %c0_95] : memref<16x2xf32, #tpu.memory_space<smem>>
    %191 = vector.broadcast %190 : f32 to vector<1x2xf32>
    %192 = arith.mulf %189, %191 : vector<1x2xf32>
    %193 = arith.addf %165, %192 : vector<1x2xf32>
    %c6_96 = arith.constant 6 : index
    %c1_97 = arith.constant 1 : index
    %194 = memref.load %arg4[%c6_96, %c1_97] : memref<16x2xf32, #tpu.memory_space<smem>>
    %195 = vector.broadcast %194 : f32 to vector<1x2xf32>
    %196 = arith.mulf %189, %195 : vector<1x2xf32>
    %197 = arith.addf %169, %196 : vector<1x2xf32>
    %c0_98 = arith.constant 0 : index
    %c7 = arith.constant 7 : index
    %198 = memref.load %arg2[%c0_98, %c7] : memref<4x16xf32, #tpu.memory_space<smem>>
    %199 = vector.broadcast %198 : f32 to vector<1x2xf32>
    %200 = arith.mulf %0, %199 : vector<1x2xf32>
    %c1_99 = arith.constant 1 : index
    %c7_100 = arith.constant 7 : index
    %201 = memref.load %arg2[%c1_99, %c7_100] : memref<4x16xf32, #tpu.memory_space<smem>>
    %202 = vector.broadcast %201 : f32 to vector<1x2xf32>
    %203 = arith.mulf %1, %202 : vector<1x2xf32>
    %204 = arith.addf %200, %203 : vector<1x2xf32>
    %c2_101 = arith.constant 2 : index
    %c7_102 = arith.constant 7 : index
    %205 = memref.load %arg2[%c2_101, %c7_102] : memref<4x16xf32, #tpu.memory_space<smem>>
    %206 = vector.broadcast %205 : f32 to vector<1x2xf32>
    %207 = arith.mulf %2, %206 : vector<1x2xf32>
    %208 = arith.addf %204, %207 : vector<1x2xf32>
    %c3_103 = arith.constant 3 : index
    %c7_104 = arith.constant 7 : index
    %209 = memref.load %arg2[%c3_103, %c7_104] : memref<4x16xf32, #tpu.memory_space<smem>>
    %210 = vector.broadcast %209 : f32 to vector<1x2xf32>
    %211 = arith.mulf %3, %210 : vector<1x2xf32>
    %212 = arith.addf %208, %211 : vector<1x2xf32>
    %c7_105 = arith.constant 7 : index
    %213 = memref.load %arg3[%c7_105] : memref<16xf32, #tpu.memory_space<smem>>
    %214 = vector.broadcast %213 : f32 to vector<1x2xf32>
    %215 = arith.addf %212, %214 : vector<1x2xf32>
    %cst_106 = arith.constant 0.000000e+00 : f32
    %216 = vector.broadcast %cst_106 : f32 to vector<1x2xf32>
    %217 = arith.maximumf %215, %216 : vector<1x2xf32>
    %c7_107 = arith.constant 7 : index
    %c0_108 = arith.constant 0 : index
    %218 = memref.load %arg4[%c7_107, %c0_108] : memref<16x2xf32, #tpu.memory_space<smem>>
    %219 = vector.broadcast %218 : f32 to vector<1x2xf32>
    %220 = arith.mulf %217, %219 : vector<1x2xf32>
    %221 = arith.addf %193, %220 : vector<1x2xf32>
    %c7_109 = arith.constant 7 : index
    %c1_110 = arith.constant 1 : index
    %222 = memref.load %arg4[%c7_109, %c1_110] : memref<16x2xf32, #tpu.memory_space<smem>>
    %223 = vector.broadcast %222 : f32 to vector<1x2xf32>
    %224 = arith.mulf %217, %223 : vector<1x2xf32>
    %225 = arith.addf %197, %224 : vector<1x2xf32>
    %c0_111 = arith.constant 0 : index
    %c8 = arith.constant 8 : index
    %226 = memref.load %arg2[%c0_111, %c8] : memref<4x16xf32, #tpu.memory_space<smem>>
    %227 = vector.broadcast %226 : f32 to vector<1x2xf32>
    %228 = arith.mulf %0, %227 : vector<1x2xf32>
    %c1_112 = arith.constant 1 : index
    %c8_113 = arith.constant 8 : index
    %229 = memref.load %arg2[%c1_112, %c8_113] : memref<4x16xf32, #tpu.memory_space<smem>>
    %230 = vector.broadcast %229 : f32 to vector<1x2xf32>
    %231 = arith.mulf %1, %230 : vector<1x2xf32>
    %232 = arith.addf %228, %231 : vector<1x2xf32>
    %c2_114 = arith.constant 2 : index
    %c8_115 = arith.constant 8 : index
    %233 = memref.load %arg2[%c2_114, %c8_115] : memref<4x16xf32, #tpu.memory_space<smem>>
    %234 = vector.broadcast %233 : f32 to vector<1x2xf32>
    %235 = arith.mulf %2, %234 : vector<1x2xf32>
    %236 = arith.addf %232, %235 : vector<1x2xf32>
    %c3_116 = arith.constant 3 : index
    %c8_117 = arith.constant 8 : index
    %237 = memref.load %arg2[%c3_116, %c8_117] : memref<4x16xf32, #tpu.memory_space<smem>>
    %238 = vector.broadcast %237 : f32 to vector<1x2xf32>
    %239 = arith.mulf %3, %238 : vector<1x2xf32>
    %240 = arith.addf %236, %239 : vector<1x2xf32>
    %c8_118 = arith.constant 8 : index
    %241 = memref.load %arg3[%c8_118] : memref<16xf32, #tpu.memory_space<smem>>
    %242 = vector.broadcast %241 : f32 to vector<1x2xf32>
    %243 = arith.addf %240, %242 : vector<1x2xf32>
    %cst_119 = arith.constant 0.000000e+00 : f32
    %244 = vector.broadcast %cst_119 : f32 to vector<1x2xf32>
    %245 = arith.maximumf %243, %244 : vector<1x2xf32>
    %c8_120 = arith.constant 8 : index
    %c0_121 = arith.constant 0 : index
    %246 = memref.load %arg4[%c8_120, %c0_121] : memref<16x2xf32, #tpu.memory_space<smem>>
    %247 = vector.broadcast %246 : f32 to vector<1x2xf32>
    %248 = arith.mulf %245, %247 : vector<1x2xf32>
    %249 = arith.addf %221, %248 : vector<1x2xf32>
    %c8_122 = arith.constant 8 : index
    %c1_123 = arith.constant 1 : index
    %250 = memref.load %arg4[%c8_122, %c1_123] : memref<16x2xf32, #tpu.memory_space<smem>>
    %251 = vector.broadcast %250 : f32 to vector<1x2xf32>
    %252 = arith.mulf %245, %251 : vector<1x2xf32>
    %253 = arith.addf %225, %252 : vector<1x2xf32>
    %c0_124 = arith.constant 0 : index
    %c9 = arith.constant 9 : index
    %254 = memref.load %arg2[%c0_124, %c9] : memref<4x16xf32, #tpu.memory_space<smem>>
    %255 = vector.broadcast %254 : f32 to vector<1x2xf32>
    %256 = arith.mulf %0, %255 : vector<1x2xf32>
    %c1_125 = arith.constant 1 : index
    %c9_126 = arith.constant 9 : index
    %257 = memref.load %arg2[%c1_125, %c9_126] : memref<4x16xf32, #tpu.memory_space<smem>>
    %258 = vector.broadcast %257 : f32 to vector<1x2xf32>
    %259 = arith.mulf %1, %258 : vector<1x2xf32>
    %260 = arith.addf %256, %259 : vector<1x2xf32>
    %c2_127 = arith.constant 2 : index
    %c9_128 = arith.constant 9 : index
    %261 = memref.load %arg2[%c2_127, %c9_128] : memref<4x16xf32, #tpu.memory_space<smem>>
    %262 = vector.broadcast %261 : f32 to vector<1x2xf32>
    %263 = arith.mulf %2, %262 : vector<1x2xf32>
    %264 = arith.addf %260, %263 : vector<1x2xf32>
    %c3_129 = arith.constant 3 : index
    %c9_130 = arith.constant 9 : index
    %265 = memref.load %arg2[%c3_129, %c9_130] : memref<4x16xf32, #tpu.memory_space<smem>>
    %266 = vector.broadcast %265 : f32 to vector<1x2xf32>
    %267 = arith.mulf %3, %266 : vector<1x2xf32>
    %268 = arith.addf %264, %267 : vector<1x2xf32>
    %c9_131 = arith.constant 9 : index
    %269 = memref.load %arg3[%c9_131] : memref<16xf32, #tpu.memory_space<smem>>
    %270 = vector.broadcast %269 : f32 to vector<1x2xf32>
    %271 = arith.addf %268, %270 : vector<1x2xf32>
    %cst_132 = arith.constant 0.000000e+00 : f32
    %272 = vector.broadcast %cst_132 : f32 to vector<1x2xf32>
    %273 = arith.maximumf %271, %272 : vector<1x2xf32>
    %c9_133 = arith.constant 9 : index
    %c0_134 = arith.constant 0 : index
    %274 = memref.load %arg4[%c9_133, %c0_134] : memref<16x2xf32, #tpu.memory_space<smem>>
    %275 = vector.broadcast %274 : f32 to vector<1x2xf32>
    %276 = arith.mulf %273, %275 : vector<1x2xf32>
    %277 = arith.addf %249, %276 : vector<1x2xf32>
    %c9_135 = arith.constant 9 : index
    %c1_136 = arith.constant 1 : index
    %278 = memref.load %arg4[%c9_135, %c1_136] : memref<16x2xf32, #tpu.memory_space<smem>>
    %279 = vector.broadcast %278 : f32 to vector<1x2xf32>
    %280 = arith.mulf %273, %279 : vector<1x2xf32>
    %281 = arith.addf %253, %280 : vector<1x2xf32>
    %c0_137 = arith.constant 0 : index
    %c10 = arith.constant 10 : index
    %282 = memref.load %arg2[%c0_137, %c10] : memref<4x16xf32, #tpu.memory_space<smem>>
    %283 = vector.broadcast %282 : f32 to vector<1x2xf32>
    %284 = arith.mulf %0, %283 : vector<1x2xf32>
    %c1_138 = arith.constant 1 : index
    %c10_139 = arith.constant 10 : index
    %285 = memref.load %arg2[%c1_138, %c10_139] : memref<4x16xf32, #tpu.memory_space<smem>>
    %286 = vector.broadcast %285 : f32 to vector<1x2xf32>
    %287 = arith.mulf %1, %286 : vector<1x2xf32>
    %288 = arith.addf %284, %287 : vector<1x2xf32>
    %c2_140 = arith.constant 2 : index
    %c10_141 = arith.constant 10 : index
    %289 = memref.load %arg2[%c2_140, %c10_141] : memref<4x16xf32, #tpu.memory_space<smem>>
    %290 = vector.broadcast %289 : f32 to vector<1x2xf32>
    %291 = arith.mulf %2, %290 : vector<1x2xf32>
    %292 = arith.addf %288, %291 : vector<1x2xf32>
    %c3_142 = arith.constant 3 : index
    %c10_143 = arith.constant 10 : index
    %293 = memref.load %arg2[%c3_142, %c10_143] : memref<4x16xf32, #tpu.memory_space<smem>>
    %294 = vector.broadcast %293 : f32 to vector<1x2xf32>
    %295 = arith.mulf %3, %294 : vector<1x2xf32>
    %296 = arith.addf %292, %295 : vector<1x2xf32>
    %c10_144 = arith.constant 10 : index
    %297 = memref.load %arg3[%c10_144] : memref<16xf32, #tpu.memory_space<smem>>
    %298 = vector.broadcast %297 : f32 to vector<1x2xf32>
    %299 = arith.addf %296, %298 : vector<1x2xf32>
    %cst_145 = arith.constant 0.000000e+00 : f32
    %300 = vector.broadcast %cst_145 : f32 to vector<1x2xf32>
    %301 = arith.maximumf %299, %300 : vector<1x2xf32>
    %c10_146 = arith.constant 10 : index
    %c0_147 = arith.constant 0 : index
    %302 = memref.load %arg4[%c10_146, %c0_147] : memref<16x2xf32, #tpu.memory_space<smem>>
    %303 = vector.broadcast %302 : f32 to vector<1x2xf32>
    %304 = arith.mulf %301, %303 : vector<1x2xf32>
    %305 = arith.addf %277, %304 : vector<1x2xf32>
    %c10_148 = arith.constant 10 : index
    %c1_149 = arith.constant 1 : index
    %306 = memref.load %arg4[%c10_148, %c1_149] : memref<16x2xf32, #tpu.memory_space<smem>>
    %307 = vector.broadcast %306 : f32 to vector<1x2xf32>
    %308 = arith.mulf %301, %307 : vector<1x2xf32>
    %309 = arith.addf %281, %308 : vector<1x2xf32>
    %c0_150 = arith.constant 0 : index
    %c11 = arith.constant 11 : index
    %310 = memref.load %arg2[%c0_150, %c11] : memref<4x16xf32, #tpu.memory_space<smem>>
    %311 = vector.broadcast %310 : f32 to vector<1x2xf32>
    %312 = arith.mulf %0, %311 : vector<1x2xf32>
    %c1_151 = arith.constant 1 : index
    %c11_152 = arith.constant 11 : index
    %313 = memref.load %arg2[%c1_151, %c11_152] : memref<4x16xf32, #tpu.memory_space<smem>>
    %314 = vector.broadcast %313 : f32 to vector<1x2xf32>
    %315 = arith.mulf %1, %314 : vector<1x2xf32>
    %316 = arith.addf %312, %315 : vector<1x2xf32>
    %c2_153 = arith.constant 2 : index
    %c11_154 = arith.constant 11 : index
    %317 = memref.load %arg2[%c2_153, %c11_154] : memref<4x16xf32, #tpu.memory_space<smem>>
    %318 = vector.broadcast %317 : f32 to vector<1x2xf32>
    %319 = arith.mulf %2, %318 : vector<1x2xf32>
    %320 = arith.addf %316, %319 : vector<1x2xf32>
    %c3_155 = arith.constant 3 : index
    %c11_156 = arith.constant 11 : index
    %321 = memref.load %arg2[%c3_155, %c11_156] : memref<4x16xf32, #tpu.memory_space<smem>>
    %322 = vector.broadcast %321 : f32 to vector<1x2xf32>
    %323 = arith.mulf %3, %322 : vector<1x2xf32>
    %324 = arith.addf %320, %323 : vector<1x2xf32>
    %c11_157 = arith.constant 11 : index
    %325 = memref.load %arg3[%c11_157] : memref<16xf32, #tpu.memory_space<smem>>
    %326 = vector.broadcast %325 : f32 to vector<1x2xf32>
    %327 = arith.addf %324, %326 : vector<1x2xf32>
    %cst_158 = arith.constant 0.000000e+00 : f32
    %328 = vector.broadcast %cst_158 : f32 to vector<1x2xf32>
    %329 = arith.maximumf %327, %328 : vector<1x2xf32>
    %c11_159 = arith.constant 11 : index
    %c0_160 = arith.constant 0 : index
    %330 = memref.load %arg4[%c11_159, %c0_160] : memref<16x2xf32, #tpu.memory_space<smem>>
    %331 = vector.broadcast %330 : f32 to vector<1x2xf32>
    %332 = arith.mulf %329, %331 : vector<1x2xf32>
    %333 = arith.addf %305, %332 : vector<1x2xf32>
    %c11_161 = arith.constant 11 : index
    %c1_162 = arith.constant 1 : index
    %334 = memref.load %arg4[%c11_161, %c1_162] : memref<16x2xf32, #tpu.memory_space<smem>>
    %335 = vector.broadcast %334 : f32 to vector<1x2xf32>
    %336 = arith.mulf %329, %335 : vector<1x2xf32>
    %337 = arith.addf %309, %336 : vector<1x2xf32>
    %c0_163 = arith.constant 0 : index
    %c12 = arith.constant 12 : index
    %338 = memref.load %arg2[%c0_163, %c12] : memref<4x16xf32, #tpu.memory_space<smem>>
    %339 = vector.broadcast %338 : f32 to vector<1x2xf32>
    %340 = arith.mulf %0, %339 : vector<1x2xf32>
    %c1_164 = arith.constant 1 : index
    %c12_165 = arith.constant 12 : index
    %341 = memref.load %arg2[%c1_164, %c12_165] : memref<4x16xf32, #tpu.memory_space<smem>>
    %342 = vector.broadcast %341 : f32 to vector<1x2xf32>
    %343 = arith.mulf %1, %342 : vector<1x2xf32>
    %344 = arith.addf %340, %343 : vector<1x2xf32>
    %c2_166 = arith.constant 2 : index
    %c12_167 = arith.constant 12 : index
    %345 = memref.load %arg2[%c2_166, %c12_167] : memref<4x16xf32, #tpu.memory_space<smem>>
    %346 = vector.broadcast %345 : f32 to vector<1x2xf32>
    %347 = arith.mulf %2, %346 : vector<1x2xf32>
    %348 = arith.addf %344, %347 : vector<1x2xf32>
    %c3_168 = arith.constant 3 : index
    %c12_169 = arith.constant 12 : index
    %349 = memref.load %arg2[%c3_168, %c12_169] : memref<4x16xf32, #tpu.memory_space<smem>>
    %350 = vector.broadcast %349 : f32 to vector<1x2xf32>
    %351 = arith.mulf %3, %350 : vector<1x2xf32>
    %352 = arith.addf %348, %351 : vector<1x2xf32>
    %c12_170 = arith.constant 12 : index
    %353 = memref.load %arg3[%c12_170] : memref<16xf32, #tpu.memory_space<smem>>
    %354 = vector.broadcast %353 : f32 to vector<1x2xf32>
    %355 = arith.addf %352, %354 : vector<1x2xf32>
    %cst_171 = arith.constant 0.000000e+00 : f32
    %356 = vector.broadcast %cst_171 : f32 to vector<1x2xf32>
    %357 = arith.maximumf %355, %356 : vector<1x2xf32>
    %c12_172 = arith.constant 12 : index
    %c0_173 = arith.constant 0 : index
    %358 = memref.load %arg4[%c12_172, %c0_173] : memref<16x2xf32, #tpu.memory_space<smem>>
    %359 = vector.broadcast %358 : f32 to vector<1x2xf32>
    %360 = arith.mulf %357, %359 : vector<1x2xf32>
    %361 = arith.addf %333, %360 : vector<1x2xf32>
    %c12_174 = arith.constant 12 : index
    %c1_175 = arith.constant 1 : index
    %362 = memref.load %arg4[%c12_174, %c1_175] : memref<16x2xf32, #tpu.memory_space<smem>>
    %363 = vector.broadcast %362 : f32 to vector<1x2xf32>
    %364 = arith.mulf %357, %363 : vector<1x2xf32>
    %365 = arith.addf %337, %364 : vector<1x2xf32>
    %c0_176 = arith.constant 0 : index
    %c13 = arith.constant 13 : index
    %366 = memref.load %arg2[%c0_176, %c13] : memref<4x16xf32, #tpu.memory_space<smem>>
    %367 = vector.broadcast %366 : f32 to vector<1x2xf32>
    %368 = arith.mulf %0, %367 : vector<1x2xf32>
    %c1_177 = arith.constant 1 : index
    %c13_178 = arith.constant 13 : index
    %369 = memref.load %arg2[%c1_177, %c13_178] : memref<4x16xf32, #tpu.memory_space<smem>>
    %370 = vector.broadcast %369 : f32 to vector<1x2xf32>
    %371 = arith.mulf %1, %370 : vector<1x2xf32>
    %372 = arith.addf %368, %371 : vector<1x2xf32>
    %c2_179 = arith.constant 2 : index
    %c13_180 = arith.constant 13 : index
    %373 = memref.load %arg2[%c2_179, %c13_180] : memref<4x16xf32, #tpu.memory_space<smem>>
    %374 = vector.broadcast %373 : f32 to vector<1x2xf32>
    %375 = arith.mulf %2, %374 : vector<1x2xf32>
    %376 = arith.addf %372, %375 : vector<1x2xf32>
    %c3_181 = arith.constant 3 : index
    %c13_182 = arith.constant 13 : index
    %377 = memref.load %arg2[%c3_181, %c13_182] : memref<4x16xf32, #tpu.memory_space<smem>>
    %378 = vector.broadcast %377 : f32 to vector<1x2xf32>
    %379 = arith.mulf %3, %378 : vector<1x2xf32>
    %380 = arith.addf %376, %379 : vector<1x2xf32>
    %c13_183 = arith.constant 13 : index
    %381 = memref.load %arg3[%c13_183] : memref<16xf32, #tpu.memory_space<smem>>
    %382 = vector.broadcast %381 : f32 to vector<1x2xf32>
    %383 = arith.addf %380, %382 : vector<1x2xf32>
    %cst_184 = arith.constant 0.000000e+00 : f32
    %384 = vector.broadcast %cst_184 : f32 to vector<1x2xf32>
    %385 = arith.maximumf %383, %384 : vector<1x2xf32>
    %c13_185 = arith.constant 13 : index
    %c0_186 = arith.constant 0 : index
    %386 = memref.load %arg4[%c13_185, %c0_186] : memref<16x2xf32, #tpu.memory_space<smem>>
    %387 = vector.broadcast %386 : f32 to vector<1x2xf32>
    %388 = arith.mulf %385, %387 : vector<1x2xf32>
    %389 = arith.addf %361, %388 : vector<1x2xf32>
    %c13_187 = arith.constant 13 : index
    %c1_188 = arith.constant 1 : index
    %390 = memref.load %arg4[%c13_187, %c1_188] : memref<16x2xf32, #tpu.memory_space<smem>>
    %391 = vector.broadcast %390 : f32 to vector<1x2xf32>
    %392 = arith.mulf %385, %391 : vector<1x2xf32>
    %393 = arith.addf %365, %392 : vector<1x2xf32>
    %c0_189 = arith.constant 0 : index
    %c14 = arith.constant 14 : index
    %394 = memref.load %arg2[%c0_189, %c14] : memref<4x16xf32, #tpu.memory_space<smem>>
    %395 = vector.broadcast %394 : f32 to vector<1x2xf32>
    %396 = arith.mulf %0, %395 : vector<1x2xf32>
    %c1_190 = arith.constant 1 : index
    %c14_191 = arith.constant 14 : index
    %397 = memref.load %arg2[%c1_190, %c14_191] : memref<4x16xf32, #tpu.memory_space<smem>>
    %398 = vector.broadcast %397 : f32 to vector<1x2xf32>
    %399 = arith.mulf %1, %398 : vector<1x2xf32>
    %400 = arith.addf %396, %399 : vector<1x2xf32>
    %c2_192 = arith.constant 2 : index
    %c14_193 = arith.constant 14 : index
    %401 = memref.load %arg2[%c2_192, %c14_193] : memref<4x16xf32, #tpu.memory_space<smem>>
    %402 = vector.broadcast %401 : f32 to vector<1x2xf32>
    %403 = arith.mulf %2, %402 : vector<1x2xf32>
    %404 = arith.addf %400, %403 : vector<1x2xf32>
    %c3_194 = arith.constant 3 : index
    %c14_195 = arith.constant 14 : index
    %405 = memref.load %arg2[%c3_194, %c14_195] : memref<4x16xf32, #tpu.memory_space<smem>>
    %406 = vector.broadcast %405 : f32 to vector<1x2xf32>
    %407 = arith.mulf %3, %406 : vector<1x2xf32>
    %408 = arith.addf %404, %407 : vector<1x2xf32>
    %c14_196 = arith.constant 14 : index
    %409 = memref.load %arg3[%c14_196] : memref<16xf32, #tpu.memory_space<smem>>
    %410 = vector.broadcast %409 : f32 to vector<1x2xf32>
    %411 = arith.addf %408, %410 : vector<1x2xf32>
    %cst_197 = arith.constant 0.000000e+00 : f32
    %412 = vector.broadcast %cst_197 : f32 to vector<1x2xf32>
    %413 = arith.maximumf %411, %412 : vector<1x2xf32>
    %c14_198 = arith.constant 14 : index
    %c0_199 = arith.constant 0 : index
    %414 = memref.load %arg4[%c14_198, %c0_199] : memref<16x2xf32, #tpu.memory_space<smem>>
    %415 = vector.broadcast %414 : f32 to vector<1x2xf32>
    %416 = arith.mulf %413, %415 : vector<1x2xf32>
    %417 = arith.addf %389, %416 : vector<1x2xf32>
    %c14_200 = arith.constant 14 : index
    %c1_201 = arith.constant 1 : index
    %418 = memref.load %arg4[%c14_200, %c1_201] : memref<16x2xf32, #tpu.memory_space<smem>>
    %419 = vector.broadcast %418 : f32 to vector<1x2xf32>
    %420 = arith.mulf %413, %419 : vector<1x2xf32>
    %421 = arith.addf %393, %420 : vector<1x2xf32>
    %c0_202 = arith.constant 0 : index
    %c15 = arith.constant 15 : index
    %422 = memref.load %arg2[%c0_202, %c15] : memref<4x16xf32, #tpu.memory_space<smem>>
    %423 = vector.broadcast %422 : f32 to vector<1x2xf32>
    %424 = arith.mulf %0, %423 : vector<1x2xf32>
    %c1_203 = arith.constant 1 : index
    %c15_204 = arith.constant 15 : index
    %425 = memref.load %arg2[%c1_203, %c15_204] : memref<4x16xf32, #tpu.memory_space<smem>>
    %426 = vector.broadcast %425 : f32 to vector<1x2xf32>
    %427 = arith.mulf %1, %426 : vector<1x2xf32>
    %428 = arith.addf %424, %427 : vector<1x2xf32>
    %c2_205 = arith.constant 2 : index
    %c15_206 = arith.constant 15 : index
    %429 = memref.load %arg2[%c2_205, %c15_206] : memref<4x16xf32, #tpu.memory_space<smem>>
    %430 = vector.broadcast %429 : f32 to vector<1x2xf32>
    %431 = arith.mulf %2, %430 : vector<1x2xf32>
    %432 = arith.addf %428, %431 : vector<1x2xf32>
    %c3_207 = arith.constant 3 : index
    %c15_208 = arith.constant 15 : index
    %433 = memref.load %arg2[%c3_207, %c15_208] : memref<4x16xf32, #tpu.memory_space<smem>>
    %434 = vector.broadcast %433 : f32 to vector<1x2xf32>
    %435 = arith.mulf %3, %434 : vector<1x2xf32>
    %436 = arith.addf %432, %435 : vector<1x2xf32>
    %c15_209 = arith.constant 15 : index
    %437 = memref.load %arg3[%c15_209] : memref<16xf32, #tpu.memory_space<smem>>
    %438 = vector.broadcast %437 : f32 to vector<1x2xf32>
    %439 = arith.addf %436, %438 : vector<1x2xf32>
    %cst_210 = arith.constant 0.000000e+00 : f32
    %440 = vector.broadcast %cst_210 : f32 to vector<1x2xf32>
    %441 = arith.maximumf %439, %440 : vector<1x2xf32>
    %c15_211 = arith.constant 15 : index
    %c0_212 = arith.constant 0 : index
    %442 = memref.load %arg4[%c15_211, %c0_212] : memref<16x2xf32, #tpu.memory_space<smem>>
    %443 = vector.broadcast %442 : f32 to vector<1x2xf32>
    %444 = arith.mulf %441, %443 : vector<1x2xf32>
    %445 = arith.addf %417, %444 : vector<1x2xf32>
    %c15_213 = arith.constant 15 : index
    %c1_214 = arith.constant 1 : index
    %446 = memref.load %arg4[%c15_213, %c1_214] : memref<16x2xf32, #tpu.memory_space<smem>>
    %447 = vector.broadcast %446 : f32 to vector<1x2xf32>
    %448 = arith.mulf %441, %447 : vector<1x2xf32>
    %449 = arith.addf %421, %448 : vector<1x2xf32>
    %c0_215 = arith.constant 0 : index
    %450 = memref.load %arg5[%c0_215] : memref<2xf32, #tpu.memory_space<smem>>
    %451 = vector.broadcast %450 : f32 to vector<1x2xf32>
    %452 = arith.addf %445, %451 : vector<1x2xf32>
    %c1_216 = arith.constant 1 : index
    %453 = memref.load %arg5[%c1_216] : memref<2xf32, #tpu.memory_space<smem>>
    %454 = vector.broadcast %453 : f32 to vector<1x2xf32>
    %455 = arith.addf %449, %454 : vector<1x2xf32>
    %456 = arith.subf %455, %452 : vector<1x2xf32>
    %cst_217 = arith.constant 0.000000e+00 : f32
    %457 = vector.broadcast %cst_217 : f32 to vector<1x2xf32>
    %458 = arith.subf %457, %456 : vector<1x2xf32>
    %459 = math.exp %458 : vector<1x2xf32>
    %cst_218 = arith.constant 1.000000e+00 : f32
    %460 = vector.broadcast %cst_218 : f32 to vector<1x2xf32>
    %461 = arith.addf %460, %459 : vector<1x2xf32>
    %cst_219 = arith.constant 1.000000e+00 : f32
    %462 = vector.broadcast %cst_219 : f32 to vector<1x2xf32>
    %463 = arith.divf %462, %461 : vector<1x2xf32>
    %cst_220 = arith.constant 1.000000e+00 : f32
    %464 = vector.broadcast %cst_220 : f32 to vector<1x2xf32>
    %465 = arith.subf %464, %463 : vector<1x2xf32>
    %c0_221 = arith.constant 0 : index
    %c0_222 = arith.constant 0 : index
    %466 = vector.load %arg6[%c0_221, %c0_222] : memref<2x2xf32, #tpu.memory_space<vmem>>, vector<1x2xf32>
    tpu.vector_store %arg6[%c0_221, %c0_222], %465 {strides = array<i32>} : memref<2x2xf32, #tpu.memory_space<vmem>>, vector<1x2xf32>,
    %c1_223 = arith.constant 1 : index
    %c0_224 = arith.constant 0 : index
    %467 = vector.load %arg6[%c1_223, %c0_224] : memref<2x2xf32, #tpu.memory_space<vmem>>, vector<1x2xf32>
    tpu.vector_store %arg6[%c1_223, %c0_224], %463 {strides = array<i32>} : memref<2x2xf32, #tpu.memory_space<vmem>>, vector<1x2xf32>,
    return
  }
  func.func @transform_0(%arg0: i32) -> (i32, i32) {
    %c0_i32 = arith.constant 0 : i32
    %c0_i32_0 = arith.constant 0 : i32
    return %c0_i32, %arg0 : i32, i32
  }
  func.func @transform_1(%arg0: i32) -> (i32, i32) {
    %c0_i32 = arith.constant 0 : i32
    %c0_i32_0 = arith.constant 0 : i32
    %c0_i32_1 = arith.constant 0 : i32
    return %c0_i32, %c0_i32_0 : i32, i32
  }
  func.func @transform_2(%arg0: i32) -> i32 {
    %c0_i32 = arith.constant 0 : i32
    %c0_i32_0 = arith.constant 0 : i32
    return %c0_i32 : i32
  }
  func.func @transform_3(%arg0: i32) -> (i32, i32) {
    %c0_i32 = arith.constant 0 : i32
    %c0_i32_0 = arith.constant 0 : i32
    %c0_i32_1 = arith.constant 0 : i32
    return %c0_i32, %c0_i32_0 : i32, i32
  }
  func.func @transform_4(%arg0: i32) -> i32 {
    %c0_i32 = arith.constant 0 : i32
    %c0_i32_0 = arith.constant 0 : i32
    return %c0_i32 : i32
  }
  func.func @transform_5(%arg0: i32) -> (i32, i32) {
    %c0_i32 = arith.constant 0 : i32
    %c0_i32_0 = arith.constant 0 : i32
    return %c0_i32, %arg0 : i32, i32
  }
}

</mosaic_0001>

<bundles_post_ra>
// kernel: cartpole_forward_t.1
= control target key start
LH: loop header
LB: loop body
LE: loop exit
PB: predicated region body
PF: predicated region fallthrough
CT: control target
= control target key end

     0   :  { %s1160_s0 = inlined_call_operand.vmem [shape: f32[4,2], index: 0, kind: input, shape index: {}]   ;;  %s1161_s1 = inlined_call_operand.vmem [shape: f32[4,16], index: 1, kind: input, shape index: {}]   ;;  %s1162_s2 = inlined_call_operand.vmem [shape: f32[16], index: 2, kind: input, shape index: {}]   ;;  %s1163_s3 = inlined_call_operand.vmem [shape: f32[16,2], index: 3, kind: input, shape index: {}]   ;;  %s1164_s4 = inlined_call_operand.vmem [shape: f32[2], index: 4, kind: input, shape index: {}]   ;;  %s1165_s5 = inlined_call_operand.hbm [shape: f32[2,2], index: 5, kind: output, shape index: {}]  }
   0x1   :  { %1166 = sst [smem:[#allocation17_spill]] %s1165_s5 }
   0x2   :  { %10 = vsyncpa [#allocation4], 0 }
   0x3   :  { %11 = vsyncpa [#allocation6], 0 }
   0x4   :  { %12 = vsyncpa [#allocation9], 0  ;;  %s32_s20 = sshll.u32 %s1162_s2, 4  ;;  %s33_s20 = int_to_ptr.vmem [resolvable:$true] %s32_s20 }
   0x5   :  { %13 = vsyncpa [#allocation3], 0  ;;  %s22_s23 = sshll.u32 %s1161_s1, 4  ;;  %s660_s24 = scalar_lea.vmem %s33_s20, 16  ;;  %s23_s23 = int_to_ptr.vmem [resolvable:$true] %s22_s23 }
   0x6   :  { %p661_p0 = scmp.ne.s32.totalorder %s33_s20, %s660_s24  ;;  %p665_p1 = scmp.lt.s32.totalorder %s33_s20, %s33_s20 }
   0x7   :  { %p666_p2 = scmp.lt.s32.totalorder %s660_s24, %s660_s24 }
   0x9   :  { %p667_p3 = por %p666_p2, %p665_p1 }
   0xb   :  { %p668_p4 = pnand %p667_p3, %p661_p0 }
   0xd   :  { %671 = shalt.err (!%p668_p4)
}
   0xe   :  { %s736_s25 = smov [#allocation5]   ;;  %s672_s26 = scalar_lea.vmem %s23_s23, 64 }
   0xf   :  { %35 = dma.vmem_to_smem %s33_s20, 16, %s736_s25, [#allocation6]  }
  0x10   :  { %p673_p5 = scmp.ne.s32.totalorder %s23_s23, %s672_s26  ;;  %p677_p6 = scmp.lt.s32.totalorder %s23_s23, %s23_s23 }
  0x11   :  { %p678_p7 = scmp.lt.s32.totalorder %s672_s26, %s672_s26 }
  0x13   :  { %p679_p8 = por %p678_p7, %p677_p6 }
  0x15   :  { %p680_p9 = pnand %p679_p8, %p673_p5 }
  0x17   :  { %683 = shalt.err (!%p680_p9)
}
  0x18   :  { %s737_s2 = smov [#allocation2]   ;;  %s41_s28 = sshll.u32 %s1163_s3, 4  ;;  %s42_s28 = int_to_ptr.vmem [resolvable:$true] %s41_s28 }
  0x19   :  { %25 = dma.vmem_to_smem %s23_s23, 64, %s737_s2, [#allocation4]  }
  0x1a   :  { %s54_s6 = sshll.u32 %s1164_s4, 4  ;;  %s684_s7 = scalar_lea.vmem %s42_s28, 256  ;;  %s55_s6 = int_to_ptr.vmem [resolvable:$true] %s54_s6 }
  0x1b   :  { %p685_p10 = scmp.ne.s32.totalorder %s42_s28, %s684_s7  ;;  %p689_p11 = scmp.lt.s32.totalorder %s42_s28, %s42_s28 }
  0x1c   :  { %p690_p12 = scmp.lt.s32.totalorder %s684_s7, %s684_s7 }
  0x1e   :  { %p691_p13 = por %p690_p12, %p689_p11 }
  0x20   :  { %p692_p0 = pnand %p691_p13, %p685_p10 }
  0x22   :  { %695 = shalt.err (!%p692_p0)
}
  0x23   :  { %s738_s8 = smov [#allocation7]   ;;  %s739_s9 = smov 128  }
  0x24   :  { %s740_s10 = smov 8   ;;  %s696_s11 = scalar_lea.vmem %s55_s6, 16 }
  0x25   :  { %47 = dma.vmem_to_smem %s42_s28, 256, %s738_s8, [#allocation6], %s739_s9, %s739_s9, %s740_s10  }
  0x26   :  { %p697_p1 = scmp.ne.s32.totalorder %s55_s6, %s696_s11  ;;  %p701_p2 = scmp.lt.s32.totalorder %s55_s6, %s55_s6 }
  0x27   :  { %p702_p3 = scmp.lt.s32.totalorder %s696_s11, %s696_s11 }
  0x29   :  { %p703_p4 = por %p702_p3, %p701_p2 }
  0x2b   :  { %p704_p5 = pnand %p703_p4, %p697_p1 }
  0x2d   :  { %707 = shalt.err (!%p704_p5)
}
  0x2e   :  { %s741_s3 = smov [#allocation8]  }
  0x2f   :  { %57 = dma.vmem_to_smem %s55_s6, 16, %s741_s3, [#allocation9]  }
  0x30   :  { %728 = dma.done.wait [#allocation4], 64  }
  0x31   :  { %729 = vsyncadd [#allocation4], 4294967232 }
  0x32   :  { %730 = dma.done.wait [#allocation6], 272  }
  0x33   :  { %731 = vsyncadd [#allocation6], 4294967024 }
  0x34   :  { %732 = dma.done.wait [#allocation9], 16  }
  0x35   :  { %733 = vsyncadd [#allocation9], 4294967280 }
  0x36   :  { %70 = sfence }
  0x37   :  { %s785_s4 = sld [smem:[#allocation2]]  ;;  %v838_v0 = vld [vmem:[%s1160_s0] sm:$0x1]  ;;  %v843_v1 = vld [vmem:[%s1160_s0 + $0x1] sm:$0x1]  ;;  %vm519_vm0 = vcmask 8192  }
  0x38   :  { %s787_s12 = sld [smem:[#allocation2 + $0x80]]  ;;  %v862_v8 = vld [vmem:[%s1160_s0 + $0x2] sm:$0x1]  ;;  %v880_v15 = vld [vmem:[%s1160_s0 + $0x3] sm:$0x1] }
  0x39   :  { %s789_s13 = sld [smem:[#allocation2 + $0x100]] }
  0x3a   :  { %s791_s14 = sld [smem:[#allocation2 + $0x180]] }
  0x3b   :  { %s793_s15 = sld [smem:[#allocation5]] }
  0x3c   :  { %s795_s16 = sld [smem:[#allocation7]] }
  0x3d   :  { %s797_s17 = sld [smem:[#allocation7 + $0x1]]  ;;  %v76_v2 = vstv %s785_s4 }
  0x3e   :  { %s799_s18 = sld [smem:[#allocation2 + $0x1]]  ;;  %v79_v3 = vstv %s787_s12  ;;  %v77_v6 = vmul.f32 %v76_v2, %v838_v0 }
  0x3f   :  { %s801_s19 = sld [smem:[#allocation2 + $0x81]]  ;;  %v80_v7 = vmul.f32 %v79_v3, %v843_v1  ;;  %v83_v9 = vstv %s789_s13 }
  0x40   :  { %s803_s20 = sld [smem:[#allocation2 + $0x101]]  ;;  %v84_v14 = vmul.f32 %v83_v9, %v862_v8  ;;  %v87_v16 = vstv %s791_s14 }
  0x41   :  { %s805_s21 = sld [smem:[#allocation2 + $0x181]]  ;;  %v81_v13 = vadd.f32 %v80_v7, %v77_v6  ;;  %v88_v23 = vmul.f32 %v87_v16, %v880_v15  ;;  %v91_v32 = vstv %s793_s15 }
  0x42   :  { %s807_s22 = sld [smem:[#allocation5 + $0x1]]  ;;  %v95_v51 = vstv %s795_s16 }
  0x43   :  { %s809_s23 = sld [smem:[#allocation7 + $0x80]]  ;;  %v85_v22 = vadd.f32 %v84_v14, %v81_v13  ;;  %v98_v55 = vstv %s797_s17 }
  0x44   :  { %s811_s24 = sld [smem:[#allocation7 + $0x81]]  ;;  %v101_v4 = vstv %s799_s18 }
  0x45   :  { %s813_s25 = sld [smem:[#allocation2 + $0x2]]  ;;  %v104_v5 = vstv %s801_s19  ;;  %v102_v10 = vmul.f32 %v101_v4, %v838_v0  ;;  %v89_v31 = vadd.f32 %v88_v23, %v85_v22 }
  0x46   :  { %s815_s26 = sld [smem:[#allocation2 + $0x82]]  ;;  %v105_v11 = vmul.f32 %v104_v5, %v843_v1  ;;  %v108_v12 = vstv %s803_s20 }
  0x47   :  { %s817_s2 = sld [smem:[#allocation2 + $0x102]]  ;;  %v109_v18 = vmul.f32 %v108_v12, %v862_v8  ;;  %v112_v19 = vstv %s805_s21  ;;  %v92_v43 = vadd.f32 %v91_v32, %v89_v31 }
  0x48   :  { %s819_s1 = sld [smem:[#allocation2 + $0x182]]  ;;  %v106_v17 = vadd.f32 %v105_v11, %v102_v10  ;;  %v113_v25 = vmul.f32 %v112_v19, %v880_v15  ;;  %v116_v36 = vstv %s807_s22 }
  0x49   :  { %s821_s27 = sld [smem:[#allocation5 + $0x2]]  ;;  %v93_v54 = vmax.f32 %v92_v43, 0.0  ;;  %v120_v59 = vstv %s809_s23 }
  0x4a   :  { %s823_s28 = sld [smem:[#allocation7 + $0x100]]  ;;  %v110_v24 = vadd.f32 %v109_v18, %v106_v17  ;;  %v124_v7 = vstv %s811_s24 }
  0x4b   :  { %s825_s29 = sld [smem:[#allocation7 + $0x101]]  ;;  %v128_v20 = vstv %s813_s25  ;;  %v96_v12 = vmul.f32 %v95_v51, %v93_v54  ;;  %v99_v13 = vmul.f32 %v98_v55, %v93_v54 }
  0x4c   :  { %s827_s30 = sld [smem:[#allocation2 + $0x3]]  ;;  %v131_v21 = vstv %s815_s26  ;;  %v129_v26 = vmul.f32 %v128_v20, %v838_v0  ;;  %v114_v33 = vadd.f32 %v113_v25, %v110_v24 }
  0x4d   :  { %s829_s6 = sld [smem:[#allocation2 + $0x83]]  ;;  %v132_v27 = vmul.f32 %v131_v21, %v843_v1  ;;  %v135_v28 = vstv %s817_s2 }
  0x4e   :  { %s831_s7 = sld [smem:[#allocation2 + $0x103]]  ;;  %v136_v35 = vmul.f32 %v135_v28, %v862_v8  ;;  %v139_v37 = vstv %s819_s1  ;;  %v117_v44 = vadd.f32 %v116_v36, %v114_v33 }
  0x4f   :  { %s833_s8 = sld [smem:[#allocation2 + $0x183]]  ;;  %v133_v34 = vadd.f32 %v132_v27, %v129_v26  ;;  %v140_v46 = vmul.f32 %v139_v37, %v880_v15  ;;  %v143_v61 = vstv %s821_s27 }
  0x50   :  { %1167 = sst [smem:[#allocation15_spill]] %s823_s28  ;;  %v118_v58 = vmax.f32 %v117_v44, 0.0 }
  0x51   :  { %1168 = sst [smem:[#allocation16_spill]] %s825_s29  ;;  %v137_v45 = vadd.f32 %v136_v35, %v133_v34 }
  0x52   :  { %s847_s5 = sld [smem:[#allocation5 + $0x3]]  ;;  %v155_v29 = vstv %s827_s30  ;;  %v121_v14 = vmul.f32 %v120_v59, %v118_v58  ;;  %v125_v25 = vmul.f32 %v124_v7, %v118_v58 }
  0x53   :  { %s851_s29 = sld [smem:[#allocation7 + $0x180]]  ;;  %v158_v30 = vstv %s829_s6  ;;  %v156_v38 = vmul.f32 %v155_v29, %v838_v0  ;;  %v141_v60 = vadd.f32 %v140_v46, %v137_v45 }
  0x54   :  { %s853_s28 = sld [smem:[#allocation7 + $0x181]]  ;;  %v159_v39 = vmul.f32 %v158_v30, %v843_v1  ;;  %v162_v40 = vstv %s831_s7  ;;  %v122_v33 = vadd.f32 %v121_v14, %v96_v12 }
  0x55   :  { %s857_s9 = sld [smem:[#allocation2 + $0x4]]  ;;  %v163_v48 = vmul.f32 %v162_v40, %v862_v8  ;;  %v166_v52 = vstv %s833_s8  ;;  %v144_v16 = vadd.f32 %v143_v61, %v141_v60 }
  0x56   :  { %s867_s4 = sld [smem:[#allocation2 + $0x84]]  ;;  %v160_v47 = vadd.f32 %v159_v39, %v156_v38  ;;  %v167_v63 = vmul.f32 %v166_v52, %v880_v15 }
  0x57   :  { %s870_s12 = sld [smem:[#allocation2 + $0x104]]  ;;  %v145_v29 = vmax.f32 %v144_v16, 0.0 }
  0x58   :  { %s872_s18 = sld [smem:[#allocation2 + $0x184]]  ;;  %v164_v62 = vadd.f32 %v163_v48, %v160_v47  ;;  %v170_v18 = vstv %s847_s5 }
  0x59   :  { %s875_s19 = sld [smem:[#allocation5 + $0x4]]  ;;  %v174_v47 = vstv %s851_s29 }
  0x5a   :  { %s884_s20 = sld [smem:[#allocation7 + $0x200]]  ;;  %v168_v17 = vadd.f32 %v167_v63, %v164_v62  ;;  %v178_v61 = vstv %s853_s28 }
  0x5b   :  { %s889_s10 = sld [smem:[#allocation7 + $0x201]]  ;;  %v182_v41 = vstv %s857_s9 }
  0x5c   :  { %s891_s11 = sld [smem:[#allocation2 + $0x5]]  ;;  %v185_v42 = vstv %s867_s4  ;;  %v183_v49 = vmul.f32 %v182_v41, %v838_v0  ;;  %v171_v34 = vadd.f32 %v170_v18, %v168_v17  ;;  %v126_v41 = vadd.f32 %v125_v25, %v99_v13 }
  0x5d   :  { %s894_s0 = sld [smem:[#allocation2 + $0x85]]  ;;  %v186_v50 = vmul.f32 %v185_v42, %v843_v1  ;;  %v189_v53 = vstv %s870_s12 }
  0x5e   :  { %s899_s14 = sld [smem:[#allocation2 + $0x105]]  ;;  %v190_v3 = vmul.f32 %v189_v53, %v862_v8  ;;  %v193_v4 = vstv %s872_s18 }
  0x5f   :  { %s902_s21 = sld [smem:[#allocation2 + $0x185]]  ;;  %v187_v2 = vadd.f32 %v186_v50, %v183_v49  ;;  %v194_v20 = vmul.f32 %v193_v4, %v880_v15  ;;  %v197_v36 = vstv %s875_s19  ;;  %v172_v49 = vmax.f32 %v171_v34, 0.0 }
  0x60   :  { %s906_s25 = sld [smem:[#allocation5 + $0x5]] }
  0x61   :  { %s908_s26 = sld [smem:[#allocation7 + $0x280]]  ;;  %v191_v19 = vadd.f32 %v190_v3, %v187_v2  ;;  %v175_v4 = vmul.f32 %v174_v47, %v172_v49  ;;  %v179_v16 = vmul.f32 %v178_v61, %v172_v49  ;;  %v205_v17 = vstv %s889_s10 }
  0x62   :  { %s912_s3 = sld [smem:[#allocation7 + $0x281]]  ;;  %v209_v56 = vstv %s891_s11 }
  0x63   :  { %s918_s2 = sld [smem:[#allocation2 + $0x6]]  ;;  %v212_v57 = vstv %s894_s0  ;;  %v210_v5 = vmul.f32 %v209_v56, %v838_v0  ;;  %v195_v35 = vadd.f32 %v194_v20, %v191_v19 }
  0x64   :  { %s923_s15 = sld [smem:[#allocation2 + $0x86]]  ;;  %v213_v6 = vmul.f32 %v212_v57, %v843_v1  ;;  %v216_v9 = vstv %s899_s14 }
  0x65   :  { %s925_s30 = sld [smem:[#allocation2 + $0x106]]  ;;  %v217_v22 = vmul.f32 %v216_v9, %v862_v8  ;;  %v220_v27 = vstv %s902_s21  ;;  %v198_v50 = vadd.f32 %v197_v36, %v195_v35 }
  0x66   :  { %s928_s22 = sld [smem:[#allocation2 + $0x186]]  ;;  %v214_v21 = vadd.f32 %v213_v6, %v210_v5  ;;  %v221_v38 = vmul.f32 %v220_v27, %v880_v15  ;;  %v224_v51 = vstv %s906_s25  ;;  %v201_v6 = vstv %s884_s20 }
  0x67   :  { %s933_s1 = sld [smem:[#allocation5 + $0x6]]  ;;  %v199_v5 = vmax.f32 %v198_v50, 0.0 }
  0x68   :  { %s938_s6 = sld [smem:[#allocation7 + $0x300]]  ;;  %v218_v37 = vadd.f32 %v217_v22, %v214_v21 }
  0x69   :  { %s943_s7 = sld [smem:[#allocation7 + $0x301]]  ;;  %v236_v10 = vstv %s918_s2  ;;  %v202_v21 = vmul.f32 %v201_v6, %v199_v5  ;;  %v206_v36 = vmul.f32 %v205_v17, %v199_v5 }
  0x6a   :  { %s947_s16 = sld [smem:[#allocation2 + $0x7]]  ;;  %v239_v11 = vstv %s923_s15  ;;  %v237_v23 = vmul.f32 %v236_v10, %v838_v0  ;;  %v222_v53 = vadd.f32 %v221_v38, %v218_v37  ;;  %v232_v37 = vstv %s912_s3 }
  0x6b   :  { %s951_s17 = sld [smem:[#allocation2 + $0x87]]  ;;  %v240_v24 = vmul.f32 %v239_v11, %v843_v1  ;;  %v243_v28 = vstv %s925_s30 }
  0x6c   :  { %s956_s23 = sld [smem:[#allocation2 + $0x107]]  ;;  %v244_v40 = vmul.f32 %v243_v28, %v862_v8  ;;  %v247_v42 = vstv %s928_s22  ;;  %v225_v7 = vadd.f32 %v224_v51, %v222_v53  ;;  %v228_v28 = vstv %s908_s26 }
  0x6d   :  { %s962_s27 = sld [smem:[#allocation2 + $0x187]]  ;;  %v241_v39 = vadd.f32 %v240_v24, %v237_v23  ;;  %v248_v55 = vmul.f32 %v247_v42, %v880_v15  ;;  %v251_v10 = vstv %s933_s1 }
  0x6e   :  { %s1169_s8 = sld [smem:[#allocation15_spill]]  ;;  %v226_v24 = vmax.f32 %v225_v7, 0.0  ;;  %v255_v42 = vstv %s938_s6 }
  0x6f   :  { %s964_s9 = sld [smem:[#allocation5 + $0x7]]  ;;  %v245_v54 = vadd.f32 %v244_v40, %v241_v39 }
  0x70   :  { %s1170_s4 = sld [smem:[#allocation16_spill]]  ;;  %v263_v31 = vstv %s947_s16  ;;  %v229_v40 = vmul.f32 %v228_v28, %v226_v24 }
  0x71   :  { %s968_s24 = sld [smem:[#allocation7 + $0x380]]  ;;  %v266_v32 = vstv %s951_s17  ;;  %v264_v43 = vmul.f32 %v263_v31, %v838_v0  ;;  %v249_v9 = vadd.f32 %v248_v55, %v245_v54 }
  0x72   :  { %s973_s12 = sld [smem:[#allocation7 + $0x381]]  ;;  %v267_v44 = vmul.f32 %v266_v32, %v843_v1  ;;  %v270_v48 = vstv %s956_s23 }
  0x73   :  { %s978_s5 = sld [smem:[#allocation2 + $0x8]]  ;;  %v271_v58 = vmul.f32 %v270_v48, %v862_v8  ;;  %v274_v62 = vstv %s962_s27  ;;  %v252_v25 = vadd.f32 %v251_v10, %v249_v9 }
  0x74   :  { %v147_v26 = vstv %s1169_s8  ;;  %s983_s18 = sld [smem:[#allocation2 + $0x88]]  ;;  %v268_v57 = vadd.f32 %v267_v44, %v264_v43  ;;  %v275_v12 = vmul.f32 %v274_v62, %v880_v15 }
  0x75   :  { %s986_s13 = sld [smem:[#allocation2 + $0x108]]  ;;  %v148_v45 = vmul.f32 %v147_v26, %v145_v29  ;;  %v278_v32 = vstv %s964_s9 }
  0x76   :  { %v151_v30 = vstv %s1170_s4  ;;  %s990_s11 = sld [smem:[#allocation2 + $0x188]]  ;;  %v272_v11 = vadd.f32 %v271_v58, %v268_v57  ;;  %v259_v57 = vstv %s943_s7 }
  0x77   :  { %s995_s19 = sld [smem:[#allocation5 + $0x8]]  ;;  %v152_v46 = vmul.f32 %v151_v30, %v145_v29  ;;  %v149_v2 = vadd.f32 %v148_v45, %v122_v33 }
  0x78   :  { %s999_s0 = sld [smem:[#allocation7 + $0x400]]  ;;  %v276_v29 = vadd.f32 %v275_v12, %v272_v11  ;;  %v286_v5 = vstv %s973_s12 }
  0x79   :  { %v290_v52 = vstv %s978_s5  ;;  %s1003_s14 = sld [smem:[#allocation7 + $0x401]]  ;;  %v153_v3 = vadd.f32 %v152_v46, %v126_v41  ;;  %v176_v20 = vadd.f32 %v175_v4, %v149_v2  ;;  %v253_v41 = vmax.f32 %v252_v25, 0.0 }
  0x7a   :  { %v293_v56 = vstv %s983_s18  ;;  %s1007_s21 = sld [smem:[#allocation2 + $0x9]]  ;;  %v291_v59 = vmul.f32 %v290_v52, %v838_v0  ;;  %v279_v43 = vadd.f32 %v278_v32, %v276_v29  ;;  %v233_v52 = vmul.f32 %v232_v37, %v226_v24 }
  0x7b   :  { %v294_v60 = vmul.f32 %v293_v56, %v843_v1  ;;  %s1012_s29 = sld [smem:[#allocation2 + $0x89]]  ;;  %v297_v63 = vstv %s986_s13  ;;  %v180_v35 = vadd.f32 %v179_v16, %v153_v3  ;;  %v203_v39 = vadd.f32 %v202_v21, %v176_v20 }
  0x7c   :  { %s1017_s25 = sld [smem:[#allocation2 + $0x109]]  ;;  %v298_v14 = vmul.f32 %v297_v63, %v862_v8  ;;  %v301_v18 = vstv %s990_s11  ;;  %v256_v56 = vmul.f32 %v255_v42, %v253_v41  ;;  %v282_v63 = vstv %s968_s24 }
  0x7d   :  { %s1019_s2 = sld [smem:[#allocation2 + $0x189]]  ;;  %v295_v13 = vadd.f32 %v294_v60, %v291_v59  ;;  %v302_v31 = vmul.f32 %v301_v18, %v880_v15  ;;  %v305_v45 = vstv %s995_s19  ;;  %v207_v51 = vadd.f32 %v206_v36, %v180_v35 }
  0x7e   :  { %s1023_s15 = sld [smem:[#allocation5 + $0x9]]  ;;  %v230_v55 = vadd.f32 %v229_v40, %v203_v39  ;;  %v280_v59 = vmax.f32 %v279_v43, 0.0  ;;  %v260_v4 = vmul.f32 %v259_v57, %v253_v41  ;;  %v309_v17 = vstv %s999_s0 }
  0x7f   :  { %s1027_s28 = sld [smem:[#allocation7 + $0x480]]  ;;  %v299_v30 = vadd.f32 %v298_v14, %v295_v13  ;;  %v234_v3 = vadd.f32 %v233_v52, %v207_v51  ;;  %v313_v25 = vstv %s1003_s14 }
  0x80   :  { %v317_v19 = vstv %s1007_s21  ;;  %s1032_s20 = sld [smem:[#allocation7 + $0x481]]  ;;  %v257_v7 = vadd.f32 %v256_v56, %v230_v55  ;;  %v283_v12 = vmul.f32 %v282_v63, %v280_v59 }
  0x81   :  { %v318_v22 = vmul.f32 %v317_v19, %v838_v0  ;;  %v320_v23 = vstv %s1012_s29  ;;  %s1036_s30 = sld [smem:[#allocation2 + $0xa]]  ;;  %v303_v44 = vadd.f32 %v302_v31, %v299_v30  ;;  %v261_v21 = vadd.f32 %v260_v4, %v234_v3 }
  0x82   :  { %v321_v26 = vmul.f32 %v320_v23, %v843_v1  ;;  %v324_v27 = vstv %s1017_s25  ;;  %s1040_s10 = sld [smem:[#allocation2 + $0x8a]]  ;;  %v284_v28 = vadd.f32 %v283_v12, %v257_v7 }
  0x83   :  { %s1044_s22 = sld [smem:[#allocation2 + $0x10a]]  ;;  %v325_v34 = vmul.f32 %v324_v27, %v862_v8  ;;  %v328_v38 = vstv %s1019_s2  ;;  %v306_v60 = vadd.f32 %v305_v45, %v303_v44 }
  0x84   :  { %v322_v33 = vadd.f32 %v321_v26, %v318_v22  ;;  %s1048_s1 = sld [smem:[#allocation2 + $0x18a]]  ;;  %v329_v48 = vmul.f32 %v328_v38, %v880_v15  ;;  %v332_v6 = vstv %s1023_s15  ;;  %v287_v22 = vmul.f32 %v286_v5, %v280_v59 }
  0x85   :  { %s1052_s26 = sld [smem:[#allocation5 + $0xa]]  ;;  %v307_v13 = vmax.f32 %v306_v60, 0.0  ;;  %v336_v35 = vstv %s1027_s28 }
  0x86   :  { %s1055_s16 = sld [smem:[#allocation7 + $0x500]]  ;;  %v326_v47 = vadd.f32 %v325_v34, %v322_v33  ;;  %v288_v34 = vadd.f32 %v287_v22, %v261_v21  ;;  %v340_v36 = vstv %s1032_s20 }
  0x87   :  { %v344_v46 = vstv %s1036_s30  ;;  %s1059_s17 = sld [smem:[#allocation7 + $0x501]]  ;;  %v310_v29 = vmul.f32 %v309_v17, %v307_v13  ;;  %v314_v38 = vmul.f32 %v313_v25, %v307_v13 }
  0x88   :  { %v345_v49 = vmul.f32 %v344_v46, %v838_v0  ;;  %v347_v50 = vstv %s1040_s10  ;;  %s1064_s3 = sld [smem:[#allocation2 + $0xb]]  ;;  %v330_v2 = vadd.f32 %v329_v48, %v326_v47 }
  0x89   :  { %v348_v53 = vmul.f32 %v347_v50, %v843_v1  ;;  %v351_v54 = vstv %s1044_s22  ;;  %s1068_s6 = sld [smem:[#allocation2 + $0x8b]]  ;;  %v311_v42 = vadd.f32 %v310_v29, %v284_v28  ;;  %v315_v52 = vadd.f32 %v314_v38, %v288_v34 }
  0x8a   :  { %v352_v58 = vmul.f32 %v351_v54, %v862_v8  ;;  %s1072_s23 = sld [smem:[#allocation2 + $0x10b]]  ;;  %v355_v62 = vstv %s1048_s1  ;;  %v333_v18 = vadd.f32 %v332_v6, %v330_v2 }
  0x8b   :  { %v349_v61 = vadd.f32 %v348_v53, %v345_v49  ;;  %s1075_s27 = sld [smem:[#allocation2 + $0x18b]]  ;;  %v356_v10 = vmul.f32 %v355_v62, %v880_v15  ;;  %v359_v30 = vstv %s1052_s26 }
  0x8c   :  { %s1078_s8 = sld [smem:[#allocation5 + $0xb]]  ;;  %v334_v32 = vmax.f32 %v333_v18, 0.0  ;;  %v363_v55 = vstv %s1055_s16 }
  0x8d   :  { %s1082_s7 = sld [smem:[#allocation7 + $0x580]]  ;;  %v353_v9 = vadd.f32 %v352_v58, %v349_v61  ;;  %v367_v59 = vstv %s1059_s17 }
  0x8e   :  { %v371_v11 = vstv %s1064_s3  ;;  %s1086_s9 = sld [smem:[#allocation7 + $0x581]]  ;;  %v337_v46 = vmul.f32 %v336_v35, %v334_v32  ;;  %v341_v53 = vmul.f32 %v340_v36, %v334_v32 }
  0x8f   :  { %v372_v14 = vmul.f32 %v371_v11, %v838_v0  ;;  %v374_v16 = vstv %s1068_s6  ;;  %s620_s4 = sld [smem:[#allocation2 + $0xc]]  ;;  %v357_v26 = vadd.f32 %v356_v10, %v353_v9 }
  0x90   :  { %v375_v19 = vmul.f32 %v374_v16, %v843_v1  ;;  %v378_v20 = vstv %s1072_s23  ;;  %s621_s24 = sld [smem:[#allocation2 + $0x8c]]  ;;  %v338_v58 = vadd.f32 %v337_v46, %v311_v42  ;;  %v342_v3 = vadd.f32 %v341_v53, %v315_v52 }
  0x91   :  { %v379_v23 = vmul.f32 %v378_v20, %v862_v8  ;;  %v382_v24 = vstv %s1075_s27  ;;  %s1095_s12 = sld [smem:[#allocation2 + $0x10c]]  ;;  %v360_v39 = vadd.f32 %v359_v30, %v357_v26 }
  0x92   :  { %v376_v27 = vadd.f32 %v375_v19, %v372_v14  ;;  %s623_s5 = sld [smem:[#allocation2 + $0x18c]]  ;;  %v383_v31 = vmul.f32 %v382_v24, %v880_v15  ;;  %v386_v47 = vstv %s1078_s8 }
  0x93   :  { %s1100_s18 = sld [smem:[#allocation5 + $0xc]]  ;;  %v361_v54 = vmax.f32 %v360_v39, 0.0  ;;  %v390_v12 = vstv %s1082_s7 }
  0x94   :  { %v380_v33 = vadd.f32 %v379_v23, %v376_v27  ;;  %s1102_s13 = sld [smem:[#allocation7 + $0x600]]  ;;  %v394_v18 = vstv %s1086_s9  ;;  %s742_s9 = smov [#allocation10]  }
  0x95   :  { %v398_v37 = vstv %s620_s4  ;;  %s1106_s11 = sld [smem:[#allocation7 + $0x601]]  ;;  %v364_v4 = vmul.f32 %v363_v55, %v361_v54  ;;  %v368_v7 = vmul.f32 %v367_v59, %v361_v54  ;;  %s528_s4 = sshll.u32 %s742_s9, 4  ;;  %s529_s4 = int_to_ptr.vmem [resolvable:$true] %s528_s4 }
  0x96   :  { %v399_v40 = vmul.f32 %v398_v37, %v838_v0  ;;  %v401_v41 = vstv %s621_s24  ;;  %s627_s19 = sld [smem:[#allocation2 + $0xd]]  ;;  %v384_v43 = vadd.f32 %v383_v31, %v380_v33  ;;  %s708_s24 = scalar_lea.vmem %s529_s4, 32 }
  0x97   :  { %v402_v44 = vmul.f32 %v401_v41, %v843_v1  ;;  %v405_v45 = vstv %s1095_s12  ;;  %s628_s0 = sld [smem:[#allocation2 + $0x8d]]  ;;  %v365_v17 = vadd.f32 %v364_v4, %v338_v58  ;;  %v369_v20 = vadd.f32 %v368_v7, %v342_v3  ;;  %p709_p6 = scmp.ne.s32.totalorder %s529_s4, %s708_s24 }
  0x98   :  { %v406_v48 = vmul.f32 %v405_v45, %v862_v8  ;;  %v409_v49 = vstv %s623_s5  ;;  %s629_s14 = sld [smem:[#allocation2 + $0x10d]]  ;;  %v387_v56 = vadd.f32 %v386_v47, %v384_v43  ;;  %p713_p7 = scmp.lt.s32.totalorder %s529_s4, %s529_s4 }
  0x99   :  { %v403_v50 = vadd.f32 %v402_v44, %v399_v40  ;;  %v410_v51 = vmul.f32 %v409_v49, %v880_v15  ;;  %s1114_s21 = sld [smem:[#allocation2 + $0x18d]]  ;;  %v413_v62 = vstv %s1100_s18  ;;  %p714_p8 = scmp.lt.s32.totalorder %s708_s24, %s708_s24 }
  0x9a   :  { %s1116_s29 = sld [smem:[#allocation5 + $0xd]]  ;;  %v388_v9 = vmax.f32 %v387_v56, 0.0  ;;  %v417_v29 = vstv %s1102_s13 }
  0x9b   :  { %v407_v57 = vadd.f32 %v406_v48, %v403_v50  ;;  %s1119_s25 = sld [smem:[#allocation7 + $0x680]]  ;;  %v421_v35 = vstv %s1106_s11  ;;  %p715_p9 = por %p714_p8, %p713_p7 }
  0x9c   :  { %v425_v60 = vstv %s627_s19  ;;  %s1122_s2 = sld [smem:[#allocation7 + $0x681]]  ;;  %v391_v21 = vmul.f32 %v390_v12, %v388_v9  ;;  %v395_v28 = vmul.f32 %v394_v18, %v388_v9 }
  0x9d   :  { %v411_v61 = vadd.f32 %v410_v51, %v407_v57  ;;  %v426_v63 = vmul.f32 %v425_v60, %v838_v0  ;;  %v428_v2 = vstv %s628_s0  ;;  %s634_s15 = sld [smem:[#allocation2 + $0xe]]  ;;  %p716_p10 = pnand %p715_p9, %p709_p6 }
  0x9e   :  { %v429_v5 = vmul.f32 %v428_v2, %v843_v1  ;;  %v432_v6 = vstv %s629_s14  ;;  %s635_s28 = sld [smem:[#allocation2 + $0x8e]]  ;;  %v392_v38 = vadd.f32 %v391_v21, %v365_v17  ;;  %v396_v40 = vadd.f32 %v395_v28, %v369_v20 }
  0x9f   :  { %v433_v10 = vmul.f32 %v432_v6, %v862_v8  ;;  %v436_v11 = vstv %s1114_s21  ;;  %s636_s20 = sld [smem:[#allocation2 + $0x10e]]  ;;  %v414_v13 = vadd.f32 %v413_v62, %v411_v61 }
  0xa0   :  { %v430_v14 = vadd.f32 %v429_v5, %v426_v63  ;;  %v437_v16 = vmul.f32 %v436_v11, %v880_v15  ;;  %s637_s30 = sld [smem:[#allocation2 + $0x18e]]  ;;  %v440_v22 = vstv %s1116_s29 }
  0xa1   :  { %s1131_s10 = sld [smem:[#allocation5 + $0xe]]  ;;  %v415_v24 = vmax.f32 %v414_v13, 0.0  ;;  %v444_v44 = vstv %s1119_s25 }
  0xa2   :  { %v434_v19 = vadd.f32 %v433_v10, %v430_v14  ;;  %s1134_s22 = sld [smem:[#allocation7 + $0x700]]  ;;  %v448_v47 = vstv %s1122_s2 }
  0xa3   :  { %v452_v23 = vstv %s634_s15  ;;  %s1137_s1 = sld [smem:[#allocation7 + $0x701]]  ;;  %v418_v39 = vmul.f32 %v417_v29, %v415_v24  ;;  %v422_v43 = vmul.f32 %v421_v35, %v415_v24 }
  0xa4   :  { %v438_v25 = vadd.f32 %v437_v16, %v434_v19  ;;  %v453_v26 = vmul.f32 %v452_v23, %v838_v0  ;;  %v455_v27 = vstv %s635_s28  ;;  %s641_s26 = sld [smem:[#allocation2 + $0xf]] }
  0xa5   :  { %v456_v30 = vmul.f32 %v455_v27, %v843_v1  ;;  %v459_v31 = vstv %s636_s20  ;;  %s642_s16 = sld [smem:[#allocation2 + $0x8f]]  ;;  %v419_v51 = vadd.f32 %v418_v39, %v392_v38  ;;  %v423_v58 = vadd.f32 %v422_v43, %v396_v40 }
  0xa6   :  { %v441_v32 = vadd.f32 %v440_v22, %v438_v25  ;;  %v460_v33 = vmul.f32 %v459_v31, %v862_v8  ;;  %v463_v34 = vstv %s637_s30  ;;  %s643_s17 = sld [smem:[#allocation2 + $0x10f]] }
  0xa7   :  { %v457_v36 = vadd.f32 %v456_v30, %v453_v26  ;;  %v464_v37 = vmul.f32 %v463_v34, %v880_v15  ;;  %s644_s3 = sld [smem:[#allocation2 + $0x18f]]  ;;  %v467_v45 = vstv %s1131_s10 }
  0xa8   :  { %v442_v41 = vmax.f32 %v441_v32, 0.0  ;;  %s1145_s6 = sld [smem:[#allocation5 + $0xf]]  ;;  %v471_v62 = vstv %s1134_s22 }
  0xa9   :  { %v461_v42 = vadd.f32 %v460_v33, %v457_v36  ;;  %s646_s23 = sld [smem:[#allocation7 + $0x780]]  ;;  %v475_v63 = vstv %s1137_s1 }
  0xaa   :  { %v479_v46 = vstv %s641_s26  ;;  %v445_v54 = vmul.f32 %v444_v44, %v442_v41  ;;  %s647_s27 = sld [smem:[#allocation7 + $0x781]]  ;;  %v449_v59 = vmul.f32 %v448_v47, %v442_v41 }
  0xab   :  { %v465_v48 = vadd.f32 %v464_v37, %v461_v42  ;;  %v480_v49 = vmul.f32 %v479_v46, %v838_v0  ;;  %v482_v50 = vstv %s642_s16  ;;  %s505_s8 = sld [smem:[#allocation8]] }
  0xac   :  { %v483_v52 = vmul.f32 %v482_v50, %v843_v1  ;;  %v486_v53 = vstv %s643_s17  ;;  %v446_v1 = vadd.f32 %v445_v54, %v419_v51  ;;  %s648_s7 = sld [smem:[#allocation8 + $0x1]]  ;;  %v450_v4 = vadd.f32 %v449_v59, %v423_v58 }
  0xad   :  { %v468_v55 = vadd.f32 %v467_v45, %v465_v48  ;;  %v487_v56 = vmul.f32 %v486_v53, %v862_v8  ;;  %v490_v57 = vstv %s644_s3 }
  0xae   :  { %v484_v60 = vadd.f32 %v483_v52, %v480_v49  ;;  %v491_v0 = vmul.f32 %v490_v57, %v880_v15  ;;  %v494_v3 = vstv %s1145_s6 }
  0xaf   :  { %v469_v61 = vmax.f32 %v468_v55, 0.0  ;;  %v498_v9 = vstv %s646_s23 }
  0xb0   :  { %v488_v2 = vadd.f32 %v487_v56, %v484_v60  ;;  %v502_v10 = vstv %s647_s27 }
  0xb1   :  { %v472_v5 = vmul.f32 %v471_v62, %v469_v61  ;;  %v476_v6 = vmul.f32 %v475_v63, %v469_v61  ;;  %v506_v16 = vstv %s505_s8 }
  0xb2   :  { %v492_v7 = vadd.f32 %v491_v0, %v488_v2  ;;  %v509_v17 = vstv %s648_s7 }
  0xb3   :  { %v473_v11 = vadd.f32 %v472_v5, %v446_v1  ;;  %v477_v12 = vadd.f32 %v476_v6, %v450_v4 }
  0xb4   :  { %v495_v8 = vadd.f32 %v494_v3, %v492_v7 }
  0xb6   :  { %v496_v13 = vmax.f32 %v495_v8, 0.0 }
  0xb8   :  { %v499_v14 = vmul.f32 %v498_v9, %v496_v13  ;;  %v503_v15 = vmul.f32 %v502_v10, %v496_v13 }
  0xba   :  { %v500_v18 = vadd.f32 %v499_v14, %v473_v11  ;;  %v504_v19 = vadd.f32 %v503_v15, %v477_v12 }
  0xbc   :  { %v507_v20 = vadd.f32 %v506_v16, %v500_v18  ;;  %v510_v21 = vadd.f32 %v509_v17, %v504_v19 }
  0xbe   :  { %v511_v22 = vsub.f32 %v510_v21, %v507_v20 }
  0xc0   :  { %v512_v23 = vsub.f32 0.0, %v511_v22 }
  0xc2   :  { %v513_v24 = vmul.f32 1.442695, %v512_v23 }
  0xc4   :  { %656 = vpow2.f32 %v513_v24 }
  0xd1   :  { %v657_v25 = vpop.eup %656 }
  0xd2   :  { %v515_v26 = vadd.f32 1.0, %v657_v25 }
  0xd4   :  { %658 = vrcp.f32 %v515_v26 }
  0xe1   :  { %v659_v27 = vpop.eup %658 }
  0xe2   :  { %v518_v28 = vsub.f32 1.0, %v659_v27  ;;  %521 = vst.msk [vmem:[#allocation10 + $0x1] sm:$0x1] %vm519_vm0, %v659_v27 }
  0xe4   :  { %520 = vst.msk [vmem:[#allocation10] sm:$0x1] %vm519_vm0, %v518_v28 }
  0xe5   :  { %719 = shalt.err (!%p716_p10)
}
  0xe6   :  { %s1171_s18 = sld [smem:[#allocation17_spill]] }
  0xec   :  { %531 = dma.vmem_to_hbm [thread:$0]  %s529_s4, 32, %s1171_s18, [#allocation3]  }
  0xed   :  { %734 = dma.done.wait [#allocation3], 32  }
  0xee   :  { %735 = vsyncadd [#allocation3], 4294967264 }
  0xef   :  { %535 = vsyncpa [#allocation3], 1 }
  0xf0   :  { %536 = vsyncpa [#allocation4], 1 }
  0xf1   :  { %537 = vsyncpa [#allocation6], 1 }
  0xf2   :  { %538 = vsyncpa [#allocation9], 1 }

</bundles_post_ra>
